<compile_context>
chip_gen: v7x
topology: tpu7x:2x2x1
jax: 0.10.0
libtpu: 0.0.40
codegen_flags: <defaults>
</compile_context>

<pallas_src>
import functools

import jax
import jax.numpy as jnp
from jax import lax
from jax.experimental import pallas as pl
from jax.experimental.pallas import tpu as pltpu


def _round_up(x, m):
    return (x + m - 1) // m * m


def _vmem_limit_bytes():
    # v7x has 64 MiB VMEM, v5e/v6e have 128 MiB; leave ~25% headroom for the compiler.
    cap = 64 * 1024 * 1024
    try:
        cap = int(pltpu.get_tpu_info().vmem_capacity_bytes)
    except Exception:
        pass
    return int(min(100 * 1024 * 1024, max(32 * 1024 * 1024, cap * 3 // 4)))


def _pick_tiles(m, two_k_pad):
    """Pick the M tile for the conv kernel from a VMEM budget (bf16 activation buffer
    <= 8 MiB, tm in [512, 4096], multiple of 512) while keeping >= 2 grid steps when
    M is big enough so dimension_semantics=("parallel",) can use both v7x cores."""
    budget = 8 * 1024 * 1024
    tm = max(512, min(4096, (budget // (two_k_pad * 2)) // 512 * 512))
    m_ceil = _round_up(max(m, 1), 512)
    if m_ceil >= 1024:
        tm = min(tm, _round_up(m_ceil // 2, 512))
    else:
        tm = min(tm, m_ceil)
    m_pad = _round_up(m, tm)
    return tm, m_pad


def _pick_bn_tile(m_pad):
    cap = min(8192, m_pad if m_pad < 1024 else max(512, (m_pad // 2) // 512 * 512))
    tm = 512
    for cand in range(cap, 511, -512):
        if m_pad % cand == 0:
            tm = cand
            break
    return tm


# ---------- fused LeakyReLU + packed complex conv (+ per-tile BN stats) ----------
def _conv_stats_kernel(pt_ref, wt_ref, b_ref, y_ref, st_ref, *,
                       m_total, tm, o_half, apply_act):
    pt = pt_ref[...]                                            # (tm, 2K_pad) bf16
    if apply_act:
        pt = jnp.where(pt >= 0, pt, pt * 0.01)                  # fused LeakyReLU (leaky(0)=0)
    # Packed complex matmul with the grid-invariant weight as the stationary RHS.
    y = jnp.dot(pt, wt_ref[...], preferred_element_type=jnp.float32)   # (tm, 2O_pad) f32
    b = b_ref[...]                                              # (1, 2O_pad)
    y = y + b
    y_ref[...] = y.astype(y_ref.dtype)                          # bf16 intermediate

    # Bias-shifted, row-masked raw moments for the complex batch norm
    # (shift reduces E[x^2]-E[x]^2 cancellation; var/cov are shift-invariant).
    row = pl.program_id(0) * tm + lax.broadcasted_iota(jnp.int32, (tm, 1), 0)
    ys = jnp.where(row < m_total, y - b, 0.0)
    ysw = pltpu.roll(ys, shift=o_half, axis=1)                  # partner (real<->imag) lanes
    s1 = jnp.sum(ys, axis=0, keepdims=True)                     # (1, 2O_pad) sum
    s2 = jnp.sum(ys * ys, axis=0, keepdims=True)                # sum of squares
    sc = jnp.sum(ys * ysw, axis=0, keepdims=True)               # sum of re*im
    pad = jnp.zeros((5, s1.shape[1]), jnp.float32)
    # One full-width unmasked (8, 2O_pad) store per tile.
    st_ref[...] = jnp.concatenate([s1, s2, sc, pad], axis=0)[None]


def _im2col(x2d, kh, kw, stride, pad, k_pad):
    """(B, C, H, W) -> (B*Ho*Wo, k_pad) patch matrix; rows ordered (b, ho, wo),
    columns ordered (C, kh, kw) to match w.reshape(O, C*kh*kw)."""
    B, C, H, W = x2d.shape
    xp = jnp.pad(x2d, ((0, 0), (0, 0), (pad, pad), (pad, pad)))
    Ho = (H + 2 * pad - kh) // stride + 1
    Wo = (W + 2 * pad - kw) // stride + 1
    cols = [xp[:, :, i:i + stride * Ho:stride, j:j + stride * Wo:stride]
            for i in range(kh) for j in range(kw)]
    p = jnp.stack(cols, axis=2)                                  # (B, C, kh*kw, Ho, Wo)
    p = p.transpose(0, 3, 4, 1, 2).reshape(B * Ho * Wo, C * kh * kw)
    if k_pad > C * kh * kw:
        p = jnp.pad(p, ((0, 0), (0, k_pad - C * kh * kw)))
    return p, Ho, Wo


def complex_conv_fused(x, wr, wi, br, bi, *, stride=2, pad=2, apply_act=True):
    """LeakyReLU (optional) + complex conv.  Returns the conv output in a lane-dense
    bf16 (M_pad, 2O_pad) layout plus per-tile partial BN statistics."""
    B, C, H, W, _ = x.shape
    O, _, kh, kw = wr.shape
    K = C * kh * kw
    k_pad = _round_up(K, 128)                                    # aligned contraction
    two_o_pad = _round_up(2 * O, 128)                            # lane-dense channel axis
    o_half = two_o_pad // 2                                      # real: [0,O), imag: [o_half,o_half+O)

    # TODO(synk): fuse this im2col into the kernel (halo'd row-slab DMA) to remove the
    #             ~kh*kw/stride^2 HBM blow-up of the patch matrix.
    pr, Ho, Wo = _im2col(x[..., 0], kh, kw, stride, pad, k_pad)
    pi, _, _ = _im2col(x[..., 1], kh, kw, stride, pad, k_pad)
    M = B * Ho * Wo
    tm, m_pad = _pick_tiles(M, 2 * k_pad)
    grid_m = m_pad // tm

    pt = jnp.concatenate([pr, pi], axis=1)                       # (M, 2K_pad)
    pt = jnp.pad(pt, ((0, m_pad - M), (0, 0))).astype(jnp.bfloat16)

    # Packed complex weight, stationary RHS of shape (2K_pad, 2O_pad):
    #   real cols: [wr; -wi],  imag cols: [wi; wr]
    wrf = jnp.pad(wr.reshape(O, K), ((0, 0), (0, k_pad - K)))
    wif = jnp.pad(wi.reshape(O, K), ((0, 0), (0, k_pad - K)))
    wt = jnp.zeros((2 * k_pad, two_o_pad), jnp.float32)
    wt = wt.at[:k_pad, :O].set(wrf.T).at[k_pad:, :O].set(-wif.T)
    wt = wt.at[:k_pad, o_half:o_half + O].set(wif.T).at[k_pad:, o_half:o_half + O].set(wrf.T)
    wt = wt.astype(jnp.bfloat16)

    b_row = jnp.zeros((1, two_o_pad), jnp.float32)
    b_row = b_row.at[0, :O].set(br - bi).at[0, o_half:o_half + O].set(br + bi)

    kernel = functools.partial(_conv_stats_kernel, m_total=M, tm=tm,
                               o_half=o_half, apply_act=apply_act)
    # NOTE: the weight/bias blocks are grid-invariant; pipeline_mode=pl.Buffered(1)
    # would halve their VMEM footprint on v7x but is negligible at these sizes.
    y2d, stats = pl.pallas_call(
        kernel,
        grid=(grid_m,),
        in_specs=[
            pl.BlockSpec((tm, 2 * k_pad), lambda i: (i, 0)),        # streamed activations
            pl.BlockSpec((2 * k_pad, two_o_pad), lambda i: (0, 0)),  # stationary packed weights
            pl.BlockSpec((1, two_o_pad), lambda i: (0, 0)),          # packed bias row
        ],
        out_specs=[
            pl.BlockSpec((tm, two_o_pad), lambda i: (i, 0)),         # lane-dense bf16 output
            pl.BlockSpec((1, 8, two_o_pad), lambda i: (i, 0, 0)),    # per-tile stats slab
        ],
        out_shape=[
            jax.ShapeDtypeStruct((m_pad, two_o_pad), jnp.bfloat16),
            jax.ShapeDtypeStruct((grid_m, 8, two_o_pad), jnp.float32),
        ],
        compiler_params=pltpu.CompilerParams(
            dimension_semantics=("parallel",),
            vmem_limit_bytes=_vmem_limit_bytes()),
    )(pt, wt, b_row)

    meta = dict(B=B, O=O, Ho=Ho, Wo=Wo, M=M, m_pad=m_pad,
                o_half=o_half, two_o_pad=two_o_pad, b_row=b_row)
    return y2d, stats, meta


# --------------------------- complex batch norm (apply) ---------------------------
def _bn_apply_kernel(y_ref, c_ref, o_ref, *, o_half):
    y = y_ref[...].astype(jnp.float32)                           # (tm, 2O_pad)
    mu = c_ref[0:1, :]
    diag = c_ref[1:2, :]
    cross = c_ref[2:3, :]
    beta = c_ref[3:4, :]
    xc = y - mu
    xsw = pltpu.roll(xc, shift=o_half, axis=1)                   # swap real/imag halves
    o_ref[...] = diag * xc + cross * xsw + beta


def _bn_coeffs(s1, s2, sc, n, shift, O, o_half, two_o_pad,
               gamma_r, gamma_i, gamma_ir, beta_r, beta_i):
    """Per-channel whitening coefficients from (shifted) raw-moment sums (tiny JAX)."""
    m_r = s1[:O] / n
    m_i = s1[o_half:o_half + O] / n
    mu_r = m_r + shift[:O]                                       # undo the in-kernel bias shift
    mu_i = m_i + shift[o_half:o_half + O]
    var_r = s2[:O] / n - m_r * m_r
    var_i = s2[o_half:o_half + O] / n - m_i * m_i
    cov = sc[:O] / n - m_r * m_i
    det = var_r * var_i - cov * cov + 1e-8
    ds = jnp.sqrt(det)
    t = jnp.sqrt(var_r + var_i + 2.0 * ds)
    inv = 1.0 / (ds * t + 1e-8)
    dr = (var_i + ds) * inv * gamma_r[:, 0]
    di = (var_r + ds) * inv * gamma_i[:, 0]
    dc = -cov * inv * gamma_ir[:, 0]
    coef = jnp.zeros((8, two_o_pad), jnp.float32)
    coef = coef.at[0, :O].set(mu_r).at[0, o_half:o_half + O].set(mu_i)
    coef = coef.at[1, :O].set(dr).at[1, o_half:o_half + O].set(di)
    coef = coef.at[2, :O].set(dc).at[2, o_half:o_half + O].set(dc)
    coef = coef.at[3, :O].set(beta_r[:, 0]).at[3, o_half:o_half + O].set(beta_i[:, 0])
    return coef


def complex_batch_norm_apply(y2d, coef, o_half):
    m_pad, two_o_pad = y2d.shape
    tm_bn = _pick_bn_tile(m_pad)
    grid_m = m_pad // tm_bn
    kernel = functools.partial(_bn_apply_kernel, o_half=o_half)
    return pl.pallas_call(
        kernel,
        grid=(grid_m,),
        in_specs=[pl.BlockSpec((tm_bn, two_o_pad), lambda i: (i, 0)),
                  pl.BlockSpec((8, two_o_pad), lambda i: (0, 0))],
        out_specs=pl.BlockSpec((tm_bn, two_o_pad), lambda i: (i, 0)),
        out_shape=jax.ShapeDtypeStruct((m_pad, two_o_pad), jnp.float32),
        compiler_params=pltpu.CompilerParams(
            dimension_semantics=("parallel",),
            vmem_limit_bytes=_vmem_limit_bytes()),
    )(y2d, coef)


# ------------------------------------ full block ------------------------------------
def _to_module_layout(y2d, B, O, Ho, Wo, M, o_half):
    re = y2d[:M, :O].reshape(B, Ho, Wo, O)
    im = y2d[:M, o_half:o_half + O].reshape(B, Ho, Wo, O)
    return jnp.stack([re, im], axis=-1).transpose(0, 3, 1, 2, 4)     # (B, O, Ho, Wo, 2)


def complex_conv_block(x, params, first_block=False, resid=False, stride=2, pad=2):
    apply_act = not first_block
    y2d, stats, meta = complex_conv_fused(
        x, params['wr'], params['wi'], params['br'], params['bi'],
        stride=stride, pad=pad, apply_act=apply_act)
    B, O, Ho, Wo, M = meta['B'], meta['O'], meta['Ho'], meta['Wo'], meta['M']
    o_half, two_o_pad, m_pad = meta['o_half'], meta['two_o_pad'], meta['m_pad']

    if first_block:
        return _to_module_layout(y2d.astype(jnp.float32), B, O, Ho, Wo, M, o_half)

    if resid:
        # TODO(synk): residual add (only valid for stride==1, in_ch==out_ch) should be
        # fused into the conv kernel's stats epilogue; kept in plain JAX here since the
        # default block (stride=2) never takes this path.
        x_act = jnp.where(x >= 0, x, 0.01 * x)
        xr = x_act[..., 0].transpose(0, 2, 3, 1).reshape(M, O)
        xi = x_act[..., 1].transpose(0, 2, 3, 1).reshape(M, O)
        yv = y2d[:M].astype(jnp.float32)
        yv = yv.at[:, :O].add(xr).at[:, o_half:o_half + O].add(xi)
        s1 = jnp.sum(yv, axis=0)
        s2 = jnp.sum(yv * yv, axis=0)
        scr = jnp.sum(yv[:, :O] * yv[:, o_half:o_half + O], axis=0)
        sc = jnp.zeros_like(s1).at[:O].set(scr).at[o_half:o_half + O].set(scr)
        shift = jnp.zeros((two_o_pad,), jnp.float32)
        y2d = jnp.pad(yv, ((0, m_pad - M), (0, 0))).astype(jnp.bfloat16)
    else:
        st = jnp.sum(stats, axis=0)                              # (8, 2O_pad)
        s1, s2, sc = st[0], st[1], st[2]
        shift = meta['b_row'][0]

    coef = _bn_coeffs(s1, s2, sc, M, shift, O, o_half, two_o_pad,
                      params['gamma_r'], params['gamma_i'], params['gamma_ir'],
                      params['beta_r'], params['beta_i'])
    out2d = complex_batch_norm_apply(y2d, coef, o_half)
    # TODO(synk): when blocks are chained, keep the lane-dense (M, 2O_pad) layout between
    # blocks and only run this layout pass at the network boundary.
    return _to_module_layout(out2d, B, O, Ho, Wo, M, o_half)


# ------------------------------ plain-JAX references ------------------------------
def reference_conv(x, params):
    def conv(inp, w, b):
        o = lax.conv_general_dilated(inp, w, (2, 2), ((2, 2), (2, 2)),
                                     dimension_numbers=('NCHW', 'OIHW', 'NCHW'),
                                     precision=lax.Precision.HIGHEST)
        return o + b[None, :, None, None]

    real, imag = x[..., 0], x[..., 1]
    re = conv(real, params['wr'], params['br']) - conv(imag, params['wi'], params['bi'])
    im = conv(imag, params['wr'], params['br']) + conv(real, params['wi'], params['bi'])
    return jnp.stack((re, im), axis=-1)


def reference_block(x, params):
    x_in = jnp.where(x >= 0, x, 0.01 * x)
    y = reference_conv(x_in, params)

    B, ch, H, W, _ = y.shape
    xp = y.transpose(1, 4, 0, 2, 3)
    mu = xp.mean(axis=(2, 3, 4), keepdims=True)
    xc = (xp - mu).reshape(ch, 2, -1)
    n = xc.shape[2]
    cov = jnp.einsum('cij,ckj->cik', xc, xc) / n
    var_r, var_i, c_ir = cov[:, 0, 0], cov[:, 1, 1], cov[:, 0, 1]
    det = var_r * var_i - c_ir ** 2 + 1e-8
    ds = jnp.sqrt(det)
    t = jnp.sqrt(var_r + var_i + 2 * ds)
    inv = 1.0 / (ds * t + 1e-8)
    ism_r = ((var_i + ds) * inv)[:, None] * params['gamma_r']
    ism_i = ((var_r + ds) * inv)[:, None] * params['gamma_i']
    ism_ir = (-c_ir * inv)[:, None] * params['gamma_ir']
    out_r = ism_r * xc[:, 0, :] + ism_ir * xc[:, 1, :] + params['beta_r']
    out_i = ism_ir * xc[:, 0, :] + ism_i * xc[:, 1, :] + params['beta_i']
    out = jnp.stack((out_r, out_i), axis=1).reshape(ch, 2, B, H, W)
    return out.transpose(2, 0, 3, 4, 1)


if __name__ == "__main__":
    B, C_in, C_out, H, W, K = 2, 4, 4, 16, 16, 5
    keys = jax.random.split(jax.random.PRNGKey(0), 5)
    x = jax.random.normal(keys[0], (B, C_in, H, W, 2), jnp.float32)

    fan_in = C_in * K * K
    bound = 1.0 / jnp.sqrt(jnp.float32(fan_in))
    params = dict(
        wr=jax.random.uniform(keys[1], (C_out, C_in, K, K), jnp.float32, -bound, bound),
        wi=jax.random.uniform(keys[2], (C_out, C_in, K, K), jnp.float32, -bound, bound),
        br=jax.random.uniform(keys[3], (C_out,), jnp.float32, -bound, bound),
        bi=jax.random.uniform(keys[4], (C_out,), jnp.float32, -bound, bound),
        gamma_r=jnp.full((C_out, 1), 1.0 / jnp.sqrt(2.0), jnp.float32),
        gamma_i=jnp.full((C_out, 1), 1.0 / jnp.sqrt(2.0), jnp.float32),
        gamma_ir=jnp.zeros((C_out, 1), jnp.float32),
        beta_r=jnp.zeros((C_out, 1), jnp.float32),
        beta_i=jnp.zeros((C_out, 1), jnp.float32),
    )

    # default block: LeakyReLU -> ComplexConv2D -> ComplexBatchNorm
    y = jax.block_until_ready(complex_conv_block(x, params, first_block=False, resid=False))
    y_ref = reference_block(x, params)
    assert y.shape == (B, C_out, 8, 8, 2), y.shape
    assert jnp.allclose(y, y_ref, rtol=3e-2, atol=3e-2), float(jnp.max(jnp.abs(y - y_ref)))

    # first block: complex conv only
    y0 = jax.block_until_ready(complex_conv_block(x, params, first_block=True))
    y0_ref = reference_conv(x, params)
    assert jnp.allclose(y0, y0_ref, rtol=3e-2, atol=3e-2), float(jnp.max(jnp.abs(y0 - y0_ref)))

    print("KERNEL_OK")
</pallas_src>

<mosaic_0001>
module attributes {stable_mosaic.version = 11 : i64} {
  func.func @_conv_stats_kernel(%arg0: i32, %arg1: memref<512x256xbf16, #tpu.memory_space<vmem>>, %arg2: memref<256x128xbf16, #tpu.memory_space<vmem>>, %arg3: memref<1x128xf32, #tpu.memory_space<vmem>>, %arg4: memref<512x128xbf16, #tpu.memory_space<vmem>>, %arg5: memref<1x8x128xf32, #tpu.memory_space<vmem>>) attributes {dimension_semantics = [#tpu.dimension_semantics<parallel>], iteration_bounds = array<i64: 1>, scalar_prefetch = 0 : i64, scratch_operands = 0 : i64, tpu.core_type = #tpu.core_type<tc>, window_params = [{transform_indices = @transform_0, window_bounds = array<i64: 512, 256>}, {pipeline_mode = #tpu.pipeline_mode<synchronous>, transform_indices = @transform_1, window_bounds = array<i64: 256, 128>}, {pipeline_mode = #tpu.pipeline_mode<synchronous>, transform_indices = @transform_2, window_bounds = array<i64: 1, 128>}, {transform_indices = @transform_3, window_bounds = array<i64: 512, 128>}, {transform_indices = @transform_4, window_bounds = array<i64: 1, 8, 128>}]} {
    %c0 = arith.constant 0 : index
    %c0_0 = arith.constant 0 : index
    %0 = vector.load %arg1[%c0, %c0_0] : memref<512x256xbf16, #tpu.memory_space<vmem>>, vector<512x256xbf16>
    %cst = arith.constant 0.000000e+00 : bf16
    %1 = vector.broadcast %cst : bf16 to vector<512x256xbf16>
    %2 = arith.cmpf oge, %0, %1 : vector<512x256xbf16>
    %cst_1 = arith.constant 1.000980e-02 : bf16
    %3 = vector.broadcast %cst_1 : bf16 to vector<512x256xbf16>
    %4 = arith.mulf %0, %3 : vector<512x256xbf16>
    %5 = arith.select %2, %0, %4 : vector<512x256xi1>, vector<512x256xbf16>
    %c0_2 = arith.constant 0 : index
    %c0_3 = arith.constant 0 : index
    %6 = vector.load %arg2[%c0_2, %c0_3] : memref<256x128xbf16, #tpu.memory_space<vmem>>, vector<256x128xbf16>
    %cst_4 = arith.constant dense<0.000000e+00> : vector<512x128xf32>
    %7 = tpu.matmul %5, %6, %cst_4 {dimension_numbers = #tpu.dot_dimension_numbers<[1], [0], [0], [1], [0, 0, 1, 1], [], []>} : vector<512x256xbf16>, vector<256x128xbf16>, vector<512x128xf32> -> vector<512x128xf32>
    %c0_5 = arith.constant 0 : index
    %c0_6 = arith.constant 0 : index
    %8 = vector.load %arg3[%c0_5, %c0_6] : memref<1x128xf32, #tpu.memory_space<vmem>>, vector<1x128xf32>
    %9 = vector.broadcast %8 : vector<1x128xf32> to vector<512x128xf32>
    %10 = arith.addf %7, %9 : vector<512x128xf32>
    %11 = arith.truncf %10 : vector<512x128xf32> to vector<512x128xbf16>
    %c0_7 = arith.constant 0 : index
    %c0_8 = arith.constant 0 : index
    %12 = vector.load %arg4[%c0_7, %c0_8] : memref<512x128xbf16, #tpu.memory_space<vmem>>, vector<512x128xbf16>
    tpu.vector_store %arg4[%c0_7, %c0_8], %11 {strides = array<i32>} : memref<512x128xbf16, #tpu.memory_space<vmem>>, vector<512x128xbf16>,
    %c512_i32 = arith.constant 512 : i32
    %13 = arith.muli %arg0, %c512_i32 : i32
    %14 = tpu.iota {dimensions = array<i32: 0>} : vector<512x1xi32>
    %15 = vector.broadcast %13 : i32 to vector<512x1xi32>
    %16 = arith.addi %15, %14 : vector<512x1xi32>
    %c128_i32 = arith.constant 128 : i32
    %17 = vector.broadcast %c128_i32 : i32 to vector<512x1xi32>
    %18 = arith.cmpi slt, %16, %17 : vector<512x1xi32>
    %19 = vector.broadcast %8 : vector<1x128xf32> to vector<512x128xf32>
    %20 = arith.subf %10, %19 : vector<512x128xf32>
    %cst_9 = arith.constant 0.000000e+00 : f32
    %21 = vector.shape_cast %18 : vector<512x1xi1> to vector<512x1xi1>
    %22 = vector.broadcast %21 : vector<512x1xi1> to vector<512x128xi1>
    %23 = vector.broadcast %cst_9 : f32 to vector<512x128xf32>
    %24 = arith.select %22, %20, %23 : vector<512x128xi1>, vector<512x128xf32>
    %c64_i32 = arith.constant 64 : i32
    %25 = tpu.dynamic_rotate %24 by %c64_i32 dim 1 : vector<512x128xf32>, i32 -> vector<512x128xf32>
    %cst_10 = arith.constant dense<0.000000e+00> : vector<128xf32>
    %26 = vector.multi_reduction <add>, %24, %cst_10 [0] : vector<512x128xf32> to vector<128xf32>
    %27 = vector.shape_cast %26 : vector<128xf32> to vector<1x128xf32>
    %28 = arith.mulf %24, %24 : vector<512x128xf32>
    %cst_11 = arith.constant dense<0.000000e+00> : vector<128xf32>
    %29 = vector.multi_reduction <add>, %28, %cst_11 [0] : vector<512x128xf32> to vector<128xf32>
    %30 = vector.shape_cast %29 : vector<128xf32> to vector<1x128xf32>
    %31 = arith.mulf %24, %25 : vector<512x128xf32>
    %cst_12 = arith.constant dense<0.000000e+00> : vector<128xf32>
    %32 = vector.multi_reduction <add>, %31, %cst_12 [0] : vector<512x128xf32> to vector<128xf32>
    %33 = vector.shape_cast %32 : vector<128xf32> to vector<1x128xf32>
    %cst_13 = arith.constant 0.000000e+00 : f32
    %34 = vector.broadcast %cst_13 : f32 to vector<5x128xf32>
    %35 = tpu.concatenate %27, %30, %33, %34 in 0 : vector<1x128xf32>, vector<1x128xf32>, vector<1x128xf32>, vector<5x128xf32> -> vector<8x128xf32>
    %36 = vector.shape_cast %35 : vector<8x128xf32> to vector<1x8x128xf32>
    %c0_14 = arith.constant 0 : index
    %c0_15 = arith.constant 0 : index
    %c0_16 = arith.constant 0 : index
    %37 = vector.load %arg5[%c0_14, %c0_15, %c0_16] : memref<1x8x128xf32, #tpu.memory_space<vmem>>, vector<1x8x128xf32>
    tpu.vector_store %arg5[%c0_14, %c0_15, %c0_16], %36 {strides = array<i32>} : memref<1x8x128xf32, #tpu.memory_space<vmem>>, vector<1x8x128xf32>,
    return
  }
  func.func @transform_0(%arg0: i32) -> (i32, i32) {
    %c0_i32 = arith.constant 0 : i32
    %c0_i32_0 = arith.constant 0 : i32
    return %arg0, %c0_i32 : i32, i32
  }
  func.func @transform_1(%arg0: i32) -> (i32, i32) {
    %c0_i32 = arith.constant 0 : i32
    %c0_i32_0 = arith.constant 0 : i32
    %c0_i32_1 = arith.constant 0 : i32
    return %c0_i32, %c0_i32_0 : i32, i32
  }
  func.func @transform_2(%arg0: i32) -> (i32, i32) {
    %c0_i32 = arith.constant 0 : i32
    %c0_i32_0 = arith.constant 0 : i32
    %c0_i32_1 = arith.constant 0 : i32
    return %c0_i32, %c0_i32_0 : i32, i32
  }
  func.func @transform_3(%arg0: i32) -> (i32, i32) {
    %c0_i32 = arith.constant 0 : i32
    %c0_i32_0 = arith.constant 0 : i32
    return %arg0, %c0_i32 : i32, i32
  }
  func.func @transform_4(%arg0: i32) -> (i32, i32, i32) {
    %c0_i32 = arith.constant 0 : i32
    %c0_i32_0 = arith.constant 0 : i32
    %c0_i32_1 = arith.constant 0 : i32
    return %arg0, %c0_i32, %c0_i32_0 : i32, i32, i32
  }
}

</mosaic_0001>

<bundles_post_ra>
// kernel: tpu_custom_call.1
= control target key start
LH: loop header
LB: loop body
LE: loop exit
PB: predicated region body
PF: predicated region fallthrough
CT: control target
= control target key end

     0   :  { %10 = vsyncpa [#allocation3], 0  ;;  %s3321_s0 = inlined_call_operand.hbm [shape: bf16[512,256], index: 0, kind: input, shape index: {}]   ;;  %s3322_s1 = inlined_call_operand.hbm [shape: bf16[256,128], index: 1, kind: input, shape index: {}]   ;;  %s3323_s2 = inlined_call_operand.vmem [shape: f32[1,128], index: 2, kind: input, shape index: {}]   ;;  %s3324_s3 = inlined_call_operand.hbm [shape: bf16[512,128], index: 3, kind: output, shape index: {0}]   ;;  %s3325_s4 = inlined_call_operand.hbm [shape: f32[1,8,128], index: 4, kind: output, shape index: {1}]  }
   0x1   :  { %11 = vsyncpa [#allocation6], 0 }
   0x2   :  { %12 = vsyncpa [#allocation4], 0 }
   0x3   :  { %13 = vsyncpa [#allocation9], 0  ;;  %s2875_s15 = smov [#allocation2]   ;;  %s2779_s19 = scalar_lea.hbm %s3321_s0, 8192 }
   0x4   :  { %s19_s16 = sshll.u32 %s2875_s15, 4  ;;  %p2780_p0 = scmp.ne.s32.totalorder %s3321_s0, %s2779_s19  ;;  %s20_s16 = int_to_ptr.vmem [resolvable:$true] %s19_s16 }
   0x5   :  { %p2783_p1 = scmp.lt.u32.totalorder %s2779_s19, %s3321_s0 }
   0x7   :  { %p2785_p2 = pnand %p2783_p1, %p2780_p0 }
   0x9   :  { %2788 = shalt.err (!%p2785_p2)
}
   0xa   :  { %s2789_s24 = scalar_lea.vmem %s20_s16, 8192  ;;  %p2794_p4 = scmp.lt.s32.totalorder %s20_s16, %s20_s16 }
   0xb   :  { %p2790_p3 = scmp.ne.s32.totalorder %s20_s16, %s2789_s24  ;;  %p2795_p5 = scmp.lt.s32.totalorder %s2789_s24, %s2789_s24 }
   0xd   :  { %p2796_p6 = por %p2795_p5, %p2794_p4 }
   0xf   :  { %p2797_p7 = pnand %p2796_p6, %p2790_p3 }
  0x11   :  { %2800 = shalt.err (!%p2797_p7)
}
  0x12   :  { %s2876_s25 = smov 128   ;;  %s2877_s26 = smov 8  }
  0x13   :  { %25 = dma.hbm_to_vmem [thread:$0]  %s3321_s0, 8192, %s20_s16, [#allocation3], %s2876_s25, %s2876_s25, %s2877_s26  }
  0x14   :  { %s2878_s29 = smov [#allocation5]   ;;  %s2801_s7 = scalar_lea.hbm %s3322_s1, 2048 }
  0x15   :  { %s31_s30 = sshll.u32 %s2878_s29, 4  ;;  %p2802_p8 = scmp.ne.s32.totalorder %s3322_s1, %s2801_s7  ;;  %s32_s30 = int_to_ptr.vmem [resolvable:$true] %s31_s30 }
  0x16   :  { %p2805_p9 = scmp.lt.u32.totalorder %s2801_s7, %s3322_s1 }
  0x18   :  { %p2807_p10 = pnand %p2805_p9, %p2802_p8 }
  0x1a   :  { %2810 = shalt.err (!%p2807_p10)
}
  0x1b   :  { %s2811_s12 = scalar_lea.vmem %s32_s30, 2048  ;;  %p2816_p12 = scmp.lt.s32.totalorder %s32_s30, %s32_s30 }
  0x1c   :  { %p2812_p11 = scmp.ne.s32.totalorder %s32_s30, %s2811_s12  ;;  %p2817_p13 = scmp.lt.s32.totalorder %s2811_s12, %s2811_s12 }
  0x1e   :  { %p2818_p0 = por %p2817_p13, %p2816_p12 }
  0x20   :  { %p2819_p1 = pnand %p2818_p0, %p2812_p11 }
  0x22   :  { %2822 = shalt.err (!%p2819_p1)
}
  0x23   :  { %s2879_s0 = smov 64   ;;  %s2880_s13 = smov 4  }
  0x24   :  { %37 = dma.hbm_to_vmem [thread:$0]  %s3322_s1, 2048, %s32_s30, [#allocation6], %s2879_s0, %s2879_s0, %s2880_s13  }
  0x25   :  { %2867 = dma.done.wait [#allocation3], 8192  }
  0x26   :  { %2868 = vsyncadd [#allocation3], 4294959104 }
  0x27   :  { %2869 = dma.done.wait [#allocation6], 2048  }
  0x28   :  { %2870 = vsyncadd [#allocation6], 4294965248  ;;  %v2881_v0 = vmov 0   ;;  %v2763_v1 = vld [vmem:[#allocation5] sm:$0xff]   ;;  %v2764_v2 = vld [vmem:[#allocation5 + $0x8] sm:$0xff]  }
  0x29   :  { %759 = vmatprep.subr.bf16.mxu0 %v2881_v0  ;;  %2721 = vmatprep.subr.bf16.mxu1 %v2881_v0  ;;  %v2765_v3 = vld [vmem:[#allocation5 + $0x10] sm:$0xff]   ;;  %v2766_v4 = vld [vmem:[#allocation5 + $0x18] sm:$0xff]   ;;  %v2767_v5 = vld [vmem:[#allocation5 + $0x20] sm:$0xff]  }
  0x2a   :  { %760 = vmatpush1.bf16.msra.mxu0 %v2763_v1  ;;  %2737 = vmatpush1.bf16.msra.mxu1 %v2763_v1  ;;  %v48_v6 = vld [vmem:[#allocation2] sm:$0xff]  ;;  %v49_v7 = vld [vmem:[#allocation2 + $0x8] sm:$0xff]  ;;  %v2769_v14 = vld [vmem:[#allocation5 + $0x30] sm:$0xff]  }
  0x2b   :  { %761 = vmatprep.subr.bf16.mxu0 %v2881_v0  ;;  %2722 = vmatprep.subr.bf16.mxu1 %v2881_v0  ;;  %vm112_vm0 = vcmp.ge.bf16.partialorder %v48_v6, 0  ;;  %vm113_vm1 = vcmp.ge.bf16.partialorder %v49_v7, 0  ;;  %v176_v8 = vmul.bf16 1009007652, %v48_v6  ;;  %v177_v9 = vmul.bf16 1009007652, %v49_v7 }
  0x2c   :  { %v2768_v10 = vld [vmem:[#allocation5 + $0x28] sm:$0xff]   ;;  %v2770_v15 = vld [vmem:[#allocation5 + $0x38] sm:$0xff]   ;;  %v80_v16 = vld [vmem:[#allocation2 + $0x100] sm:$0xff] }
  0x2d   :  { %v2948_v11 = vsel %vm112_vm0, %v48_v6, %v176_v8  ;;  %v2950_v12 = vsel %vm113_vm1, %v49_v7, %v177_v9  ;;  %v81_v17 = vld [vmem:[#allocation2 + $0x108] sm:$0xff]  ;;  %v2771_v18 = vld [vmem:[#allocation5 + $0x40] sm:$0xff]   ;;  %vm144_vm2 = vcmp.ge.bf16.partialorder %v80_v16, 0  ;;  %v208_v19 = vmul.bf16 1009007652, %v80_v16  ;;  %v2773_v25 = vld [vmem:[#allocation5 + $0x50] sm:$0xff]  }
  0x2e   :  { %762 = vmatpush1.bf16.msra.mxu0 %v2764_v2  ;;  %2738 = vmatpush1.bf16.msra.mxu1 %v2764_v2  ;;  %v2323_v13 = vcombine.high %v2948_v11, %v2950_v12  ;;  %vm145_vm3 = vcmp.ge.bf16.partialorder %v81_v17, 0  ;;  %v209_v20 = vmul.bf16 1009007652, %v81_v17  ;;  %v2772_v21 = vld [vmem:[#allocation5 + $0x48] sm:$0xff]   ;;  %v2774_v26 = vld [vmem:[#allocation5 + $0x58] sm:$0xff]   ;;  %v2775_v27 = vld [vmem:[#allocation5 + $0x60] sm:$0xff]   ;;  %v2322_v45 = vcombine.low %v2948_v11, %v2950_v12 }
  0x2f   :  { %763 = vmatprep.subr.bf16.mxu0 %v2881_v0  ;;  %2723 = vmatprep.subr.bf16.mxu1 %v2881_v0  ;;  %v2962_v22 = vsel %vm144_vm2, %v80_v16, %v208_v19  ;;  %v2776_v28 = vld [vmem:[#allocation5 + $0x68] sm:$0xff]   ;;  %v50_v29 = vld [vmem:[#allocation2 + $0x10] sm:$0xff]  ;;  %v51_v30 = vld [vmem:[#allocation2 + $0x18] sm:$0xff] }
  0x30   :  { %791 = vmatprep.mubr.bf16.mxu0 %v2323_v13  ;;  %v2964_v23 = vsel %vm145_vm3, %v81_v17, %v209_v20  ;;  %v82_v31 = vld [vmem:[#allocation2 + $0x110] sm:$0xff]  ;;  %v83_v32 = vld [vmem:[#allocation2 + $0x118] sm:$0xff]  ;;  %v178_v34 = vmul.bf16 1009007652, %v50_v29  ;;  %v179_v35 = vmul.bf16 1009007652, %v51_v30 }
  0x31   :  { %v2355_v24 = vcombine.high %v2962_v22, %v2964_v23  ;;  %v2777_v33 = vld [vmem:[#allocation5 + $0x70] sm:$0xff]   ;;  %vm114_vm4 = vcmp.ge.bf16.partialorder %v50_v29, 0  ;;  %vm115_vm5 = vcmp.ge.bf16.partialorder %v51_v30, 0  ;;  %v210_v36 = vmul.bf16 1009007652, %v82_v31  ;;  %v2778_v38 = vld [vmem:[#allocation5 + $0x78] sm:$0xff]  }
  0x32   :  { %764 = vmatpush1.bf16.msra.mxu0 %v2765_v3  ;;  %2739 = vmatpush1.bf16.msra.mxu1 %v2765_v3  ;;  %v211_v37 = vmul.bf16 1009007652, %v83_v32  ;;  %vm146_vm6 = vcmp.ge.bf16.partialorder %v82_v31, 0  ;;  %vm147_vm7 = vcmp.ge.bf16.partialorder %v83_v32, 0  ;;  %v242_v39 = vsel %vm114_vm4, %v50_v29, %v178_v34  ;;  %v52_v41 = vld [vmem:[#allocation2 + $0x20] sm:$0xff]  ;;  %v53_v42 = vld [vmem:[#allocation2 + $0x28] sm:$0xff] }
  0x33   :  { %765 = vmatprep.subr.bf16.mxu0 %v2881_v0  ;;  %2724 = vmatprep.subr.bf16.mxu1 %v2881_v0  ;;  %v243_v40 = vsel %vm115_vm5, %v51_v30, %v179_v35  ;;  %v274_v43 = vsel %vm146_vm6, %v82_v31, %v210_v36  ;;  %v84_v46 = vld [vmem:[#allocation2 + $0x120] sm:$0xff]  ;;  %v85_v47 = vld [vmem:[#allocation2 + $0x128] sm:$0xff]  ;;  %v2354_v49 = vcombine.low %v2962_v22, %v2964_v23  ;;  %v180_v50 = vmul.bf16 1009007652, %v52_v41  ;;  %v54_v57 = vld [vmem:[#allocation2 + $0x30] sm:$0xff] }
  0x34   :  { %919 = vmatprep.mubr.bf16.mxu1 %v2355_v24  ;;  %v275_v44 = vsel %vm147_vm7, %v83_v32, %v211_v37  ;;  %v2325_v48 = vcombine.high %v242_v39, %v243_v40  ;;  %v181_v51 = vmul.bf16 1009007652, %v53_v42  ;;  %vm116_vm8 = vcmp.ge.bf16.partialorder %v52_v41, 0  ;;  %v55_v58 = vld [vmem:[#allocation2 + $0x38] sm:$0xff]  ;;  %v86_v62 = vld [vmem:[#allocation2 + $0x130] sm:$0xff]  ;;  %v56_v9 = vld [vmem:[#allocation2 + $0x40] sm:$0xff] }
  0x35   :  { %v2357_v52 = vcombine.high %v274_v43, %v275_v44  ;;  %vm117_vm9 = vcmp.ge.bf16.partialorder %v53_v42, 0  ;;  %v212_v53 = vmul.bf16 1009007652, %v84_v46  ;;  %v213_v54 = vmul.bf16 1009007652, %v85_v47  ;;  %v87_v63 = vld [vmem:[#allocation2 + $0x138] sm:$0xff] }
  0x36   :  { %766 = vmatpush1.bf16.msra.mxu0 %v2766_v4  ;;  %2740 = vmatpush1.bf16.msra.mxu1 %v2766_v4  ;;  %vm148_vm10 = vcmp.ge.bf16.partialorder %v84_v46, 0  ;;  %vm149_vm11 = vcmp.ge.bf16.partialorder %v85_v47, 0  ;;  %v244_v55 = vsel %vm116_vm8, %v52_v41, %v180_v50  ;;  %v245_v56 = vsel %vm117_vm9, %v53_v42, %v181_v51  ;;  %v90_v30 = vld [vmem:[#allocation2 + $0x150] sm:$0xff]  ;;  %v91_v31 = vld [vmem:[#allocation2 + $0x158] sm:$0xff]  ;;  %v60_v41 = vld [vmem:[#allocation2 + $0x60] sm:$0xff] }
  0x37   :  { %767 = vmatprep.subr.bf16.mxu0 %v2881_v0  ;;  %2725 = vmatprep.subr.bf16.mxu1 %v2881_v0  ;;  %v276_v59 = vsel %vm148_vm10, %v84_v46, %v212_v53  ;;  %v277_v60 = vsel %vm149_vm11, %v85_v47, %v213_v54  ;;  %v2324_v61 = vcombine.low %v242_v39, %v243_v40  ;;  %v182_v2 = vmul.bf16 1009007652, %v54_v57  ;;  %v61_v42 = vld [vmem:[#allocation2 + $0x68] sm:$0xff]  ;;  %v92_v46 = vld [vmem:[#allocation2 + $0x160] sm:$0xff] }
  0x38   :  { %v2356_v1 = vcombine.low %v274_v43, %v275_v44  ;;  %v183_v3 = vmul.bf16 1009007652, %v55_v58  ;;  %v2359_v4 = vcombine.high %v276_v59, %v277_v60  ;;  %vm118_vm12 = vcmp.ge.bf16.partialorder %v54_v57, 0  ;;  %v93_v47 = vld [vmem:[#allocation2 + $0x168] sm:$0xff] }
  0x39   :  { %vm119_vm13 = vcmp.ge.bf16.partialorder %v55_v58, 0  ;;  %v215_v6 = vmul.bf16 1009007652, %v87_v63  ;;  %vm150_vm14 = vcmp.ge.bf16.partialorder %v86_v62, 0  ;;  %vm151_vm15 = vcmp.ge.bf16.partialorder %v87_v63, 0 }
  0x3a   :  { %768 = vmatpush1.bf16.msra.mxu0 %v2767_v5  ;;  %2741 = vmatpush1.bf16.msra.mxu1 %v2767_v5  ;;  %v214_v5 = vmul.bf16 1009007652, %v86_v62  ;;  %v246_v7 = vsel %vm118_vm12, %v54_v57, %v182_v2  ;;  %v247_v8 = vsel %vm119_vm13, %v55_v58, %v183_v3  ;;  %v2326_v13 = vcombine.low %v244_v55, %v245_v56  ;;  %v62_v57 = vld [vmem:[#allocation2 + $0x70] sm:$0xff]  ;;  %v63_v58 = vld [vmem:[#allocation2 + $0x78] sm:$0xff] }
  0x3b   :  { %769 = vmatprep.subr.bf16.mxu0 %v2881_v0  ;;  %2726 = vmatprep.subr.bf16.mxu1 %v2881_v0  ;;  %v279_v12 = vsel %vm151_vm15, %v87_v63, %v215_v6  ;;  %v2329_v16 = vcombine.high %v246_v7, %v247_v8  ;;  %v2358_v17 = vcombine.low %v276_v59, %v277_v60  ;;  %vm120_vm0 = vcmp.ge.bf16.partialorder %v56_v9, 0 }
  0x3c   :  { %v278_v11 = vsel %vm150_vm14, %v86_v62, %v214_v5  ;;  %v2328_v29 = vcombine.low %v246_v7, %v247_v8  ;;  %v218_v37 = vmul.bf16 1009007652, %v90_v30  ;;  %vm154_vm6 = vcmp.ge.bf16.partialorder %v90_v30, 0 }
  0x3d   :  { %v2361_v20 = vcombine.high %v278_v11, %v279_v12  ;;  %vm155_vm7 = vcmp.ge.bf16.partialorder %v91_v31, 0  ;;  %v188_v50 = vmul.bf16 1009007652, %v60_v41  ;;  %v189_v51 = vmul.bf16 1009007652, %v61_v42 }
  0x3e   :  { %770 = vmatpush1.bf16.msra.mxu0 %v2768_v10  ;;  %2742 = vmatpush1.bf16.msra.mxu1 %v2768_v10  ;;  %v57_v10 = vld [vmem:[#allocation2 + $0x48] sm:$0xff]  ;;  %v282_v43 = vsel %vm154_vm6, %v90_v30, %v218_v37  ;;  %vm124_vm8 = vcmp.ge.bf16.partialorder %v60_v41, 0  ;;  %vm125_vm9 = vcmp.ge.bf16.partialorder %v61_v42, 0  ;;  %v220_v53 = vmul.bf16 1009007652, %v92_v46 }
  0x3f   :  { %771 = vmatprep.subr.bf16.mxu0 %v2881_v0  ;;  %2727 = vmatprep.subr.bf16.mxu1 %v2881_v0  ;;  %v185_v19 = vmul.bf16 1009007652, %v57_v10  ;;  %vm121_vm1 = vcmp.ge.bf16.partialorder %v57_v10, 0  ;;  %v221_v54 = vmul.bf16 1009007652, %v93_v47  ;;  %vm156_vm10 = vcmp.ge.bf16.partialorder %v92_v46, 0 }
  0x40   :  { %vm157_vm11 = vcmp.ge.bf16.partialorder %v93_v47, 0  ;;  %v284_v59 = vsel %vm156_vm10, %v92_v46, %v220_v53  ;;  %vm126_vm12 = vcmp.ge.bf16.partialorder %v62_v57, 0  ;;  %vm127_vm13 = vcmp.ge.bf16.partialorder %v63_v58, 0 }
  0x41   :  { %v249_v24 = vsel %vm121_vm1, %v57_v10, %v185_v19  ;;  %v285_v60 = vsel %vm157_vm11, %v93_v47, %v221_v54  ;;  %v95_v10 = vld [vmem:[#allocation2 + $0x178] sm:$0xff]  ;;  %v96_v19 = vld [vmem:[#allocation2 + $0x180] sm:$0xff]  ;;  %v101_v54 = vld [vmem:[#allocation2 + $0x1a8] sm:$0xff] }
  0x42   :  { %772 = vmatpush1.bf16.msra.mxu0 %v2769_v14  ;;  %2743 = vmatpush1.bf16.msra.mxu1 %v2769_v14  ;;  %v88_v14 = vld [vmem:[#allocation2 + $0x140] sm:$0xff]  ;;  %v2367_v2 = vcombine.high %v284_v59, %v285_v60  ;;  %v2366_v7 = vcombine.low %v284_v59, %v285_v60  ;;  %vm159_vm15 = vcmp.ge.bf16.partialorder %v95_v10, 0  ;;  %vm165_vm11 = vcmp.ge.bf16.partialorder %v101_v54, 0 }
  0x43   :  { %773 = vmatprep.subr.bf16.mxu0 %v2881_v0  ;;  %2728 = vmatprep.subr.bf16.mxu1 %v2881_v0  ;;  %vm152_vm2 = vcmp.ge.bf16.partialorder %v88_v14, 0 }
  0x46   :  { %774 = vmatpush1.bf16.msra.mxu0 %v2770_v15  ;;  %2744 = vmatpush1.bf16.msra.mxu1 %v2770_v15  ;;  %v89_v15 = vld [vmem:[#allocation2 + $0x148] sm:$0xff] }
  0x47   :  { %775 = vmatprep.subr.bf16.mxu0 %v2881_v0  ;;  %2729 = vmatprep.subr.bf16.mxu1 %v2881_v0  ;;  %v217_v22 = vmul.bf16 1009007652, %v89_v15  ;;  %vm153_vm3 = vcmp.ge.bf16.partialorder %v89_v15, 0 }
  0x4a   :  { %776 = vmatpush1.bf16.msra.mxu0 %v2771_v18  ;;  %2745 = vmatpush1.bf16.msra.mxu1 %v2771_v18  ;;  %v184_v18 = vmul.bf16 1009007652, %v56_v9 }
  0x4b   :  { %777 = vmatprep.subr.bf16.mxu0 %v2881_v0  ;;  %2730 = vmatprep.subr.bf16.mxu1 %v2881_v0 }
  0x4c   :  { %v248_v23 = vsel %vm120_vm0, %v56_v9, %v184_v18  ;;  %v94_v9 = vld [vmem:[#allocation2 + $0x170] sm:$0xff]  ;;  %v65_v18 = vld [vmem:[#allocation2 + $0x88] sm:$0xff] }
  0x4d   :  { %v2331_v32 = vcombine.high %v248_v23, %v249_v24  ;;  %vm158_vm14 = vcmp.ge.bf16.partialorder %v94_v9, 0  ;;  %vm129_vm1 = vcmp.ge.bf16.partialorder %v65_v18, 0 }
  0x4e   :  { %778 = vmatpush1.bf16.msra.mxu0 %v2772_v21  ;;  %2746 = vmatpush1.bf16.msra.mxu1 %v2772_v21  ;;  %v216_v21 = vmul.bf16 1009007652, %v88_v14 }
  0x4f   :  { %779 = vmatprep.subr.bf16.mxu0 %v2881_v0  ;;  %2731 = vmatprep.subr.bf16.mxu1 %v2881_v0 }
  0x52   :  { %780 = vmatpush1.bf16.msra.mxu0 %v2773_v25  ;;  %2747 = vmatpush1.bf16.msra.mxu1 %v2773_v25  ;;  %v58_v25 = vld [vmem:[#allocation2 + $0x50] sm:$0xff] }
  0x53   :  { %781 = vmatprep.subr.bf16.mxu0 %v2881_v0  ;;  %2732 = vmatprep.subr.bf16.mxu1 %v2881_v0  ;;  %v186_v34 = vmul.bf16 1009007652, %v58_v25  ;;  %vm122_vm4 = vcmp.ge.bf16.partialorder %v58_v25, 0 }
  0x55   :  { %v250_v39 = vsel %vm122_vm4, %v58_v25, %v186_v34  ;;  %v224_v25 = vmul.bf16 1009007652, %v96_v19  ;;  %v67_v34 = vld [vmem:[#allocation2 + $0x98] sm:$0xff] }
  0x56   :  { %782 = vmatpush1.bf16.msra.mxu0 %v2774_v26  ;;  %2748 = vmatpush1.bf16.msra.mxu1 %v2774_v26  ;;  %v59_v26 = vld [vmem:[#allocation2 + $0x58] sm:$0xff]  ;;  %v195_v37 = vmul.bf16 1009007652, %v67_v34 }
  0x57   :  { %783 = vmatprep.subr.bf16.mxu0 %v2881_v0  ;;  %2733 = vmatprep.subr.bf16.mxu1 %v2881_v0  ;;  %v187_v35 = vmul.bf16 1009007652, %v59_v26  ;;  %vm123_vm5 = vcmp.ge.bf16.partialorder %v59_v26, 0 }
  0x59   :  { %v251_v40 = vsel %vm123_vm5, %v59_v26, %v187_v35  ;;  %v98_v35 = vld [vmem:[#allocation2 + $0x190] sm:$0xff]  ;;  %vm131_vm5 = vcmp.ge.bf16.partialorder %v67_v34, 0 }
  0x5a   :  { %784 = vmatpush1.bf16.msra.mxu0 %v2775_v27  ;;  %2749 = vmatpush1.bf16.msra.mxu1 %v2775_v27  ;;  %v280_v27 = vsel %vm152_vm2, %v88_v14, %v216_v21  ;;  %v193_v21 = vmul.bf16 1009007652, %v65_v18  ;;  %vm160_vm2 = vcmp.ge.bf16.partialorder %v96_v19, 0  ;;  %vm162_vm6 = vcmp.ge.bf16.partialorder %v98_v35, 0 }
  0x5b   :  { %785 = vmatprep.subr.bf16.mxu0 %v2881_v0  ;;  %2734 = vmatprep.subr.bf16.mxu1 %v2881_v0 }
  0x5e   :  { %786 = vmatpush1.bf16.msra.mxu0 %v2776_v28  ;;  %2750 = vmatpush1.bf16.msra.mxu1 %v2776_v28  ;;  %v281_v28 = vsel %vm153_vm3, %v89_v15, %v217_v22  ;;  %v97_v22 = vld [vmem:[#allocation2 + $0x188] sm:$0xff] }
  0x5f   :  { %787 = vmatprep.subr.bf16.mxu0 %v2881_v0  ;;  %2735 = vmatprep.subr.bf16.mxu1 %v2881_v0  ;;  %v2363_v36 = vcombine.high %v280_v27, %v281_v28  ;;  %vm161_vm3 = vcmp.ge.bf16.partialorder %v97_v22, 0  ;;  %v225_v26 = vmul.bf16 1009007652, %v97_v22 }
  0x62   :  { %788 = vmatpush1.bf16.msra.mxu0 %v2777_v33  ;;  %2751 = vmatpush1.bf16.msra.mxu1 %v2777_v33  ;;  %v2360_v33 = vcombine.low %v278_v11, %v279_v12  ;;  %v222_v11 = vmul.bf16 1009007652, %v94_v9  ;;  %v223_v12 = vmul.bf16 1009007652, %v95_v10 }
  0x63   :  { %789 = vmatprep.subr.bf16.mxu0 %v2881_v0  ;;  %2736 = vmatprep.subr.bf16.mxu1 %v2881_v0  ;;  %v2327_v0 = vcombine.high %v244_v55, %v245_v56  ;;  %v252_v55 = vsel %vm124_vm8, %v60_v41, %v188_v50  ;;  %v253_v56 = vsel %vm125_vm9, %v61_v42, %v189_v51  ;;  %v226_v41 = vmul.bf16 1009007652, %v98_v35  ;;  %v69_v50 = vld [vmem:[#allocation2 + $0xa8] sm:$0xff]  ;;  %v100_v51 = vld [vmem:[#allocation2 + $0x1a0] sm:$0xff] }
  0x64   :  { %v2335_v62 = vcombine.high %v252_v55, %v253_v56  ;;  %v2334_v5 = vcombine.low %v252_v55, %v253_v56  ;;  %v287_v14 = vsel %vm159_vm15, %v95_v10, %v223_v12  ;;  %v197_v53 = vmul.bf16 1009007652, %v69_v50 }
  0x65   :  { %vm133_vm9 = vcmp.ge.bf16.partialorder %v69_v50, 0  ;;  %vm164_vm10 = vcmp.ge.bf16.partialorder %v100_v51, 0 }
  0x66   :  { %790 = vmatpush1.bf16.msra.mxu0 %v2778_v38  ;;  %2752 = vmatpush1.bf16.msra.mxu1 %v2778_v38  ;;  %v219_v38 = vmul.bf16 1009007652, %v91_v31  ;;  %v261_v56 = vsel %vm133_vm9, %v69_v50, %v197_v53  ;;  %v77_v50 = vld [vmem:[#allocation2 + $0xe8] sm:$0xff] }
  0x67   :  { %v205_v53 = vmul.bf16 1009007652, %v77_v50  ;;  %vm141_vm9 = vcmp.ge.bf16.partialorder %v77_v50, 0 }
  0x68   :  { %v283_v44 = vsel %vm155_vm7, %v91_v31, %v219_v38  ;;  %v99_v38 = vld [vmem:[#allocation2 + $0x198] sm:$0xff] }
  0x69   :  { %792 = vmatmul.mubr.bf16.vlgmr.msra.gmra.mrb[0].mxu0 %v2322_v45  ;;  %920 = vmatmul.mubr.bf16.vlgmr.msra.gmra.mrb[0].mxu1 %v2354_v49  ;;  %v2330_v45 = vcombine.low %v248_v23, %v249_v24  ;;  %v2362_v49 = vcombine.low %v280_v27, %v281_v28  ;;  %v2364_v63 = vcombine.low %v282_v43, %v283_v44  ;;  %vm163_vm7 = vcmp.ge.bf16.partialorder %v99_v38, 0 }
  0x6a   :  { %799 = vmatprep.mubr.bf16.mxu0 %v2325_v48  ;;  %927 = vmatprep.mubr.bf16.mxu1 %v2357_v52  ;;  %v2333_v48 = vcombine.high %v250_v39, %v251_v40  ;;  %v2365_v52 = vcombine.high %v282_v43, %v283_v44  ;;  %v257_v24 = vsel %vm129_vm1, %v65_v18, %v193_v21  ;;  %v227_v42 = vmul.bf16 1009007652, %v99_v38  ;;  %v73_v18 = vld [vmem:[#allocation2 + $0xc8] sm:$0xff] }
  0x6b   :  { %v288_v28 = vsel %vm160_vm2, %v96_v19, %v224_v25  ;;  %v290_v44 = vsel %vm162_vm6, %v98_v35, %v226_v41  ;;  %v104_v19 = vld [vmem:[#allocation2 + $0x1c0] sm:$0xff]  ;;  %v201_v21 = vmul.bf16 1009007652, %v73_v18  ;;  %vm137_vm1 = vcmp.ge.bf16.partialorder %v73_v18, 0  ;;  %v106_v35 = vld [vmem:[#allocation2 + $0x1d0] sm:$0xff] }
  0x6c   :  { %vm168_vm2 = vcmp.ge.bf16.partialorder %v104_v19, 0  ;;  %v232_v25 = vmul.bf16 1009007652, %v104_v19  ;;  %vm170_vm6 = vcmp.ge.bf16.partialorder %v106_v35, 0  ;;  %v234_v41 = vmul.bf16 1009007652, %v106_v35 }
  0x71   :  { %800 = vmatmul.mubr.bf16.gmra.mrb[4].mxu0 %v2324_v61  ;;  %928 = vmatmul.mubr.bf16.gmra.mrb[4].mxu1 %v2356_v1  ;;  %v2332_v61 = vcombine.low %v250_v39, %v251_v40  ;;  %v191_v1 = vmul.bf16 1009007652, %v63_v58  ;;  %v259_v40 = vsel %vm131_vm5, %v67_v34, %v195_v37  ;;  %v75_v34 = vld [vmem:[#allocation2 + $0xd8] sm:$0xff] }
  0x72   :  { %807 = vmatprep.mubr.bf16.mxu0 %v2327_v0  ;;  %935 = vmatprep.mubr.bf16.mxu1 %v2359_v4  ;;  %v190_v0 = vmul.bf16 1009007652, %v62_v57  ;;  %v203_v37 = vmul.bf16 1009007652, %v75_v34  ;;  %vm139_vm5 = vcmp.ge.bf16.partialorder %v75_v34, 0 }
  0x73   :  { %v255_v4 = vsel %vm127_vm13, %v63_v58, %v191_v1  ;;  %v229_v58 = vmul.bf16 1009007652, %v101_v54  ;;  %v70_v1 = vld [vmem:[#allocation2 + $0xb0] sm:$0xff] }
  0x74   :  { %v254_v3 = vsel %vm126_vm12, %v62_v57, %v190_v0  ;;  %v228_v57 = vmul.bf16 1009007652, %v100_v51  ;;  %vm134_vm12 = vcmp.ge.bf16.partialorder %v70_v1, 0 }
  0x75   :  { %v2337_v6 = vcombine.high %v254_v3, %v255_v4  ;;  %v2336_v8 = vcombine.low %v254_v3, %v255_v4  ;;  %v102_v3 = vld [vmem:[#allocation2 + $0x1b0] sm:$0xff]  ;;  %v198_v4 = vmul.bf16 1009007652, %v70_v1 }
  0x76   :  { %v292_v60 = vsel %vm164_vm10, %v100_v51, %v228_v57  ;;  %v108_v51 = vld [vmem:[#allocation2 + $0x1e0] sm:$0xff] }
  0x77   :  { %vm172_vm10 = vcmp.ge.bf16.partialorder %v108_v51, 0  ;;  %v236_v57 = vmul.bf16 1009007652, %v108_v51 }
  0x79   :  { %808 = vmatmul.mubr.bf16.gmra.mrb[8].mxu0 %v2326_v13  ;;  %936 = vmatmul.mubr.bf16.gmra.mrb[8].mxu1 %v2358_v17  ;;  %v286_v13 = vsel %vm158_vm14, %v94_v9, %v222_v11  ;;  %v64_v17 = vld [vmem:[#allocation2 + $0x80] sm:$0xff]  ;;  %vm166_vm14 = vcmp.ge.bf16.partialorder %v102_v3, 0  ;;  %v230_v9 = vmul.bf16 1009007652, %v102_v3 }
  0x7a   :  { %815 = vmatprep.mubr.bf16.mxu0 %v2329_v16  ;;  %943 = vmatprep.mubr.bf16.mxu1 %v2361_v20  ;;  %v2369_v15 = vcombine.high %v286_v13, %v287_v14  ;;  %v2368_v16 = vcombine.low %v286_v13, %v287_v14  ;;  %v192_v20 = vmul.bf16 1009007652, %v64_v17  ;;  %vm128_vm0 = vcmp.ge.bf16.partialorder %v64_v17, 0 }
  0x7b   :  { %v294_v12 = vsel %vm166_vm14, %v102_v3, %v230_v9  ;;  %v110_v3 = vld [vmem:[#allocation2 + $0x1f0] sm:$0xff] }
  0x7c   :  { %v256_v23 = vsel %vm128_vm0, %v64_v17, %v192_v20  ;;  %v72_v17 = vld [vmem:[#allocation2 + $0xc0] sm:$0xff]  ;;  %vm174_vm14 = vcmp.ge.bf16.partialorder %v110_v3, 0  ;;  %v238_v9 = vmul.bf16 1009007652, %v110_v3 }
  0x7d   :  { %v2339_v27 = vcombine.high %v256_v23, %v257_v24  ;;  %v2338_v30 = vcombine.low %v256_v23, %v257_v24  ;;  %v200_v20 = vmul.bf16 1009007652, %v72_v17  ;;  %vm136_vm0 = vcmp.ge.bf16.partialorder %v72_v17, 0 }
  0x7e   :  { %v265_v24 = vsel %vm137_vm1, %v73_v18, %v201_v21 }
  0x7f   :  { %v264_v23 = vsel %vm136_vm0, %v72_v17, %v200_v20  ;;  %v2988_v17 = vld [vmem:[%s3323_s2] ss:$0 sm:$0xff]  ;;  %s2883_s2 = smov [#allocation7]  }
  0x80   :  { %s2294_s17 = sshll.u32 %s2883_s2, 4  ;;  %s2295_s17 = int_to_ptr.vmem [resolvable:$true] %s2294_s17 }
  0x81   :  { %816 = vmatmul.mubr.bf16.gmra.mrb[12].mxu0 %v2328_v29  ;;  %944 = vmatmul.mubr.bf16.gmra.mrb[12].mxu1 %v2360_v33  ;;  %v289_v29 = vsel %vm161_vm3, %v97_v22, %v225_v26  ;;  %v66_v33 = vld [vmem:[#allocation2 + $0x90] sm:$0xff]  ;;  %v105_v22 = vld [vmem:[#allocation2 + $0x1c8] sm:$0xff]  ;;  %s2823_s18 = scalar_lea.vmem %s2295_s17, 4096  ;;  %p2828_p3 = scmp.lt.s32.totalorder %s2295_s17, %s2295_s17 }
  0x82   :  { %823 = vmatprep.mubr.bf16.mxu0 %v2331_v32  ;;  %951 = vmatprep.mubr.bf16.mxu1 %v2363_v36  ;;  %v2371_v31 = vcombine.high %v288_v28, %v289_v29  ;;  %v2370_v32 = vcombine.low %v288_v28, %v289_v29  ;;  %v194_v36 = vmul.bf16 1009007652, %v66_v33  ;;  %vm130_vm4 = vcmp.ge.bf16.partialorder %v66_v33, 0  ;;  %p2824_p2 = scmp.ne.s32.totalorder %s2295_s17, %s2823_s18  ;;  %p2829_p4 = scmp.lt.s32.totalorder %s2823_s18, %s2823_s18 }
  0x83   :  { %vm169_vm3 = vcmp.ge.bf16.partialorder %v105_v22, 0  ;;  %v233_v26 = vmul.bf16 1009007652, %v105_v22  ;;  %v296_v28 = vsel %vm168_vm2, %v104_v19, %v232_v25 }
  0x84   :  { %v258_v39 = vsel %vm130_vm4, %v66_v33, %v194_v36  ;;  %v74_v33 = vld [vmem:[#allocation2 + $0xd0] sm:$0xff]  ;;  %p2830_p5 = por %p2829_p4, %p2828_p3 }
  0x85   :  { %v2341_v43 = vcombine.high %v258_v39, %v259_v40  ;;  %v2340_v46 = vcombine.low %v258_v39, %v259_v40  ;;  %v297_v29 = vsel %vm169_vm3, %v105_v22, %v233_v26  ;;  %v202_v36 = vmul.bf16 1009007652, %v74_v33 }
  0x86   :  { %vm138_vm4 = vcmp.ge.bf16.partialorder %v74_v33, 0  ;;  %v267_v40 = vsel %vm139_vm5, %v75_v34, %v203_v37  ;;  %p2831_p6 = pnand %p2830_p5, %p2824_p2 }
  0x87   :  { %v266_v39 = vsel %vm138_vm4, %v74_v33, %v202_v36 }
  0x89   :  { %824 = vmatmul.mubr.bf16.gmra.mrb[16].mxu0 %v2330_v45  ;;  %952 = vmatmul.mubr.bf16.gmra.mrb[16].mxu1 %v2362_v49  ;;  %v291_v45 = vsel %vm163_vm7, %v99_v38, %v227_v42  ;;  %v68_v49 = vld [vmem:[#allocation2 + $0xa0] sm:$0xff]  ;;  %v107_v38 = vld [vmem:[#allocation2 + $0x1d8] sm:$0xff] }
  0x8a   :  { %831 = vmatprep.mubr.bf16.mxu0 %v2333_v48  ;;  %959 = vmatprep.mubr.bf16.mxu1 %v2365_v52  ;;  %v2373_v47 = vcombine.high %v290_v44, %v291_v45  ;;  %v2372_v48 = vcombine.low %v290_v44, %v291_v45  ;;  %v196_v52 = vmul.bf16 1009007652, %v68_v49  ;;  %vm132_vm8 = vcmp.ge.bf16.partialorder %v68_v49, 0 }
  0x8b   :  { %vm171_vm7 = vcmp.ge.bf16.partialorder %v107_v38, 0  ;;  %v235_v42 = vmul.bf16 1009007652, %v107_v38  ;;  %v298_v44 = vsel %vm170_vm6, %v106_v35, %v234_v41 }
  0x8c   :  { %v260_v55 = vsel %vm132_vm8, %v68_v49, %v196_v52  ;;  %v76_v49 = vld [vmem:[#allocation2 + $0xe0] sm:$0xff] }
  0x8d   :  { %v2343_v59 = vcombine.high %v260_v55, %v261_v56  ;;  %v299_v45 = vsel %vm171_vm7, %v107_v38, %v235_v42  ;;  %v204_v52 = vmul.bf16 1009007652, %v76_v49  ;;  %vm140_vm8 = vcmp.ge.bf16.partialorder %v76_v49, 0 }
  0x91   :  { %832 = vmatmul.mubr.bf16.gmra.mrb[20].mxu0 %v2332_v61  ;;  %960 = vmatmul.mubr.bf16.gmra.mrb[20].mxu1 %v2364_v63  ;;  %v293_v61 = vsel %vm165_vm11, %v101_v54, %v229_v58  ;;  %v109_v54 = vld [vmem:[#allocation2 + $0x1e8] sm:$0xff] }
  0x92   :  { %839 = vmatprep.mubr.bf16.mxu0 %v2335_v62  ;;  %967 = vmatprep.mubr.bf16.mxu1 %v2367_v2  ;;  %v2342_v62 = vcombine.low %v260_v55, %v261_v56  ;;  %v2375_v63 = vcombine.high %v292_v60, %v293_v61  ;;  %v2374_v0 = vcombine.low %v292_v60, %v293_v61  ;;  %v71_v2 = vld [vmem:[#allocation2 + $0xb8] sm:$0xff]  ;;  %vm173_vm11 = vcmp.ge.bf16.partialorder %v109_v54, 0 }
  0x93   :  { %vm135_vm13 = vcmp.ge.bf16.partialorder %v71_v2, 0  ;;  %v268_v55 = vsel %vm140_vm8, %v76_v49, %v204_v52  ;;  %v269_v56 = vsel %vm141_vm9, %v77_v50, %v205_v53  ;;  %v237_v58 = vmul.bf16 1009007652, %v109_v54 }
  0x94   :  { %v300_v60 = vsel %vm172_vm10, %v108_v51, %v236_v57 }
  0x95   :  { %v301_v61 = vsel %vm173_vm11, %v109_v54, %v237_v58 }
  0x99   :  { %840 = vmatmul.mubr.bf16.gmra.mrb[24].mxu0 %v2334_v5  ;;  %968 = vmatmul.mubr.bf16.gmra.mrb[24].mxu1 %v2366_v7  ;;  %v199_v5 = vmul.bf16 1009007652, %v71_v2  ;;  %v262_v7 = vsel %vm134_vm12, %v70_v1, %v198_v4  ;;  %v78_v1 = vld [vmem:[#allocation2 + $0xf0] sm:$0xff] }
  0x9a   :  { %847 = vmatprep.mubr.bf16.mxu0 %v2337_v6  ;;  %975 = vmatprep.mubr.bf16.mxu1 %v2369_v15  ;;  %v103_v6 = vld [vmem:[#allocation2 + $0x1b8] sm:$0xff]  ;;  %v206_v4 = vmul.bf16 1009007652, %v78_v1  ;;  %vm142_vm12 = vcmp.ge.bf16.partialorder %v78_v1, 0 }
  0x9b   :  { %vm167_vm15 = vcmp.ge.bf16.partialorder %v103_v6, 0  ;;  %v231_v10 = vmul.bf16 1009007652, %v103_v6 }
  0x9d   :  { %v295_v13 = vsel %vm167_vm15, %v103_v6, %v231_v10  ;;  %v111_v6 = vld [vmem:[#allocation2 + $0x1f8] sm:$0xff] }
  0x9e   :  { %v2377_v15 = vcombine.high %v294_v12, %v295_v13  ;;  %vm175_vm15 = vcmp.ge.bf16.partialorder %v111_v6, 0  ;;  %v239_v10 = vmul.bf16 1009007652, %v111_v6 }
  0xa1   :  { %848 = vmatmul.mubr.bf16.gmra.mrb[28].mxu0 %v2336_v8  ;;  %976 = vmatmul.mubr.bf16.gmra.mrb[28].mxu1 %v2368_v16  ;;  %v263_v8 = vsel %vm135_vm13, %v71_v2, %v199_v5  ;;  %v2376_v16 = vcombine.low %v294_v12, %v295_v13  ;;  %v79_v2 = vld [vmem:[#allocation2 + $0xf8] sm:$0xff]  ;;  %v302_v12 = vsel %vm174_vm14, %v110_v3, %v238_v9 }
  0xa2   :  { %855 = vmatprep.mubr.bf16.mxu0 %v2339_v27  ;;  %983 = vmatprep.mubr.bf16.mxu1 %v2371_v31  ;;  %v2345_v11 = vcombine.high %v262_v7, %v263_v8  ;;  %v2344_v14 = vcombine.low %v262_v7, %v263_v8  ;;  %v2347_v27 = vcombine.high %v264_v23, %v265_v24  ;;  %v207_v5 = vmul.bf16 1009007652, %v79_v2 }
  0xa3   :  { %v2379_v31 = vcombine.high %v296_v28, %v297_v29  ;;  %vm143_vm13 = vcmp.ge.bf16.partialorder %v79_v2, 0  ;;  %v270_v7 = vsel %vm142_vm12, %v78_v1, %v206_v4  ;;  %v303_v13 = vsel %vm175_vm15, %v111_v6, %v239_v10 }
  0xa4   :  { %v271_v8 = vsel %vm143_vm13, %v79_v2, %v207_v5 }
  0xa9   :  { %856 = vmatmul.mubr.bf16.gmra.mrb[32].mxu0 %v2338_v30  ;;  %984 = vmatmul.mubr.bf16.gmra.mrb[32].mxu1 %v2370_v32  ;;  %v2346_v30 = vcombine.low %v264_v23, %v265_v24  ;;  %v2378_v32 = vcombine.low %v296_v28, %v297_v29 }
  0xaa   :  { %863 = vmatprep.mubr.bf16.mxu0 %v2341_v43  ;;  %991 = vmatprep.mubr.bf16.mxu1 %v2373_v47  ;;  %v2349_v43 = vcombine.high %v266_v39, %v267_v40  ;;  %v2381_v47 = vcombine.high %v298_v44, %v299_v45 }
  0xb1   :  { %864 = vmatmul.mubr.bf16.gmra.mrb[36].mxu0 %v2340_v46  ;;  %992 = vmatmul.mubr.bf16.gmra.mrb[36].mxu1 %v2372_v48  ;;  %v2348_v46 = vcombine.low %v266_v39, %v267_v40  ;;  %v2380_v48 = vcombine.low %v298_v44, %v299_v45 }
  0xb2   :  { %871 = vmatprep.mubr.bf16.mxu0 %v2343_v59  ;;  %999 = vmatprep.mubr.bf16.mxu1 %v2375_v63  ;;  %v2351_v59 = vcombine.high %v268_v55, %v269_v56  ;;  %v2383_v63 = vcombine.high %v300_v60, %v301_v61 }
  0xb9   :  { %872 = vmatmul.mubr.bf16.gmra.mrb[40].mxu0 %v2342_v62  ;;  %1000 = vmatmul.mubr.bf16.gmra.mrb[40].mxu1 %v2374_v0  ;;  %v2350_v62 = vcombine.low %v268_v55, %v269_v56  ;;  %v2382_v0 = vcombine.low %v300_v60, %v301_v61 }
  0xba   :  { %879 = vmatprep.mubr.bf16.mxu0 %v2345_v11  ;;  %1007 = vmatprep.mubr.bf16.mxu1 %v2377_v15  ;;  %v2353_v11 = vcombine.high %v270_v7, %v271_v8  ;;  %v2385_v15 = vcombine.high %v302_v12, %v303_v13 }
  0xc1   :  { %880 = vmatmul.mubr.bf16.gmra.mrb[44].mxu0 %v2344_v14  ;;  %1008 = vmatmul.mubr.bf16.gmra.mrb[44].mxu1 %v2376_v16  ;;  %v2352_v14 = vcombine.low %v270_v7, %v271_v8  ;;  %v2384_v16 = vcombine.low %v302_v12, %v303_v13 }
  0xc2   :  { %887 = vmatprep.mubr.bf16.mxu0 %v2347_v27  ;;  %1015 = vmatprep.mubr.bf16.mxu1 %v2379_v31 }
  0xc9   :  { %888 = vmatmul.mubr.bf16.gmra.mrb[48].mxu0 %v2346_v30  ;;  %1016 = vmatmul.mubr.bf16.gmra.mrb[48].mxu1 %v2378_v32 }
  0xca   :  { %895 = vmatprep.mubr.bf16.mxu0 %v2349_v43  ;;  %1023 = vmatprep.mubr.bf16.mxu1 %v2381_v47 }
  0xd1   :  { %896 = vmatmul.mubr.bf16.gmra.mrb[52].mxu0 %v2348_v46  ;;  %1024 = vmatmul.mubr.bf16.gmra.mrb[52].mxu1 %v2380_v48 }
  0xd2   :  { %903 = vmatprep.mubr.bf16.mxu0 %v2351_v59  ;;  %1031 = vmatprep.mubr.bf16.mxu1 %v2383_v63 }
  0xd9   :  { %904 = vmatmul.mubr.bf16.gmra.mrb[56].mxu0 %v2350_v62  ;;  %1032 = vmatmul.mubr.bf16.gmra.mrb[56].mxu1 %v2382_v0 }
  0xda   :  { %911 = vmatprep.mubr.bf16.mxu0 %v2353_v11  ;;  %1039 = vmatprep.mubr.bf16.mxu1 %v2385_v15 }
  0xe1   :  { %912 = vmatmul.mubr.bf16.gmra.mrb[60].mxu0 %v2352_v14  ;;  %1040 = vmatmul.mubr.bf16.gmra.mrb[60].mxu1 %v2384_v16 }
 0x13c   :  { %v793_v18 = vpop.f32.mrb[0].mxu0  ;;  %v921_v58 = vpop.f32.mrb[0].mxu1 }
 0x13d   :  { %v794_v19 = vadd.f32 %v2988_v17, %v793_v18  ;;  %v795_v20 = vpop.f32.mrb[1].mxu0  ;;  %v923_v62 = vpop.f32.mrb[1].mxu1  ;;  %v922_v63 = vadd.f32 %v2988_v17, %v921_v58 }
 0x13e   :  { %v796_v21 = vpop.f32.mrb[2].mxu0  ;;  %v924_v0 = vpop.f32.mrb[2].mxu1 }
 0x13f   :  { %v2992_v22 = vsub.f32 %v794_v19, %v2988_v17  ;;  %v797_v23 = vadd.f32 %v2988_v17, %v796_v21  ;;  %v798_v24 = vpop.f32.mrb[3].mxu0  ;;  %v926_v3 = vpop.f32.mrb[3].mxu1  ;;  %v925_v4 = vadd.f32 %v2988_v17, %v924_v0  ;;  %v2882_v0 = vmov 0.0  }
 0x141   :  { %v2533_v25 = vpack.c.bf16 %v797_v23, %v794_v19  ;;  %1819 = vrot.lane.b32.xlu0 %v2992_v22, %s2879_s0  ;;  %v2998_v26 = vsub.f32 %v797_v23, %v2988_v17  ;;  %v2613_v6 = vpack.c.bf16 %v925_v4, %v922_v63 }
 0x143   :  { %2534 = vst [vmem:[#allocation7] sm:$0xff] %v2533_v25   ;;  %2705 = vst [vmem:[#allocation7 + $0x80] sm:$0xff] %v2613_v6  }
 0x144   :  { %v801_v27 = vpop.f32.mrb[4].mxu0  ;;  %v929_v10 = vpop.f32.mrb[4].mxu1 }
 0x145   :  { %v802_v28 = vadd.f32 %v2988_v17, %v801_v27  ;;  %v803_v29 = vpop.f32.mrb[5].mxu0  ;;  %1821 = vrot.lane.b32.xlu0 %v2998_v26, %s2879_s0  ;;  %v931_v14 = vpop.f32.mrb[5].mxu1  ;;  %v930_v15 = vadd.f32 %v2988_v17, %v929_v10 }
 0x146   :  { %v804_v30 = vpop.f32.mrb[6].mxu0  ;;  %v932_v16 = vpop.f32.mrb[6].mxu1 }
 0x147   :  { %v3004_v31 = vsub.f32 %v802_v28, %v2988_v17  ;;  %v805_v32 = vadd.f32 %v2988_v17, %v804_v30  ;;  %v806_v33 = vpop.f32.mrb[7].mxu0  ;;  %v934_v20 = vpop.f32.mrb[7].mxu1  ;;  %v933_v21 = vadd.f32 %v2988_v17, %v932_v16 }
 0x149   :  { %v2538_v34 = vpack.c.bf16 %v805_v32, %v802_v28  ;;  %1823 = vrot.lane.b32.xlu1 %v3004_v31, %s2879_s0  ;;  %v3010_v35 = vsub.f32 %v805_v32, %v2988_v17  ;;  %v2618_v24 = vpack.c.bf16 %v933_v21, %v930_v15 }
 0x14b   :  { %2690 = vst [vmem:[#allocation7 + $0x8] sm:$0xff] %v2538_v34   ;;  %2706 = vst [vmem:[#allocation7 + $0x88] sm:$0xff] %v2618_v24  }
 0x14c   :  { %v809_v36 = vpop.f32.mrb[8].mxu0  ;;  %v937_v29 = vpop.f32.mrb[8].mxu1 }
 0x14d   :  { %v810_v37 = vadd.f32 %v2988_v17, %v809_v36  ;;  %v811_v38 = vpop.f32.mrb[9].mxu0  ;;  %1825 = vrot.lane.b32.xlu1 %v3010_v35, %s2879_s0  ;;  %v939_v34 = vpop.f32.mrb[9].mxu1  ;;  %v938_v36 = vadd.f32 %v2988_v17, %v937_v29 }
 0x14e   :  { %v812_v39 = vpop.f32.mrb[10].mxu0 }
 0x14f   :  { %v3016_v40 = vsub.f32 %v810_v37, %v2988_v17  ;;  %v813_v41 = vadd.f32 %v2988_v17, %v812_v39  ;;  %v814_v42 = vpop.f32.mrb[11].mxu0 }
 0x151   :  { %v2543_v43 = vpack.c.bf16 %v813_v41, %v810_v37  ;;  %v3020_v44 = vsub.f32 %v813_v41, %v2988_v17  ;;  %1827 = vrot.lane.b32.xlu0 %v3016_v40, %s2879_s0  ;;  %v940_v37 = vpop.f32.mrb[10].mxu1 }
 0x152   :  { %v942_v41 = vpop.f32.mrb[11].mxu1  ;;  %v941_v42 = vadd.f32 %v2988_v17, %v940_v37 }
 0x153   :  { %2691 = vst [vmem:[#allocation7 + $0x10] sm:$0xff] %v2543_v43   ;;  %1829 = vrot.lane.b32.xlu1 %v3020_v44, %s2879_s0 }
 0x154   :  { %v817_v45 = vpop.f32.mrb[12].mxu0 }
 0x155   :  { %v818_v46 = vadd.f32 %v2988_v17, %v817_v45  ;;  %v819_v47 = vpop.f32.mrb[13].mxu0  ;;  %v2623_v45 = vpack.c.bf16 %v941_v42, %v938_v36 }
 0x156   :  { %v820_v48 = vpop.f32.mrb[14].mxu0 }
 0x157   :  { %v3028_v49 = vsub.f32 %v818_v46, %v2988_v17  ;;  %v821_v50 = vadd.f32 %v2988_v17, %v820_v48  ;;  %v822_v51 = vpop.f32.mrb[15].mxu0  ;;  %2707 = vst [vmem:[#allocation7 + $0x90] sm:$0xff] %v2623_v45  }
 0x159   :  { %v2548_v52 = vpack.c.bf16 %v821_v50, %v818_v46  ;;  %v3032_v53 = vsub.f32 %v821_v50, %v2988_v17  ;;  %1831 = vrot.lane.b32.xlu0 %v3028_v49, %s2879_s0  ;;  %v945_v50 = vpop.f32.mrb[12].mxu1 }
 0x15b   :  { %2692 = vst [vmem:[#allocation7 + $0x18] sm:$0xff] %v2548_v52   ;;  %1833 = vrot.lane.b32.xlu1 %v3032_v53, %s2879_s0 }
 0x15c   :  { %v825_v54 = vpop.f32.mrb[16].mxu0 }
 0x15d   :  { %v826_v55 = vadd.f32 %v2988_v17, %v825_v54  ;;  %v827_v56 = vpop.f32.mrb[17].mxu0 }
 0x15e   :  { %v828_v57 = vpop.f32.mrb[18].mxu0  ;;  %v946_v56 = vadd.f32 %v2988_v17, %v945_v50 }
 0x15f   :  { %v3040_v59 = vsub.f32 %v826_v55, %v2988_v17  ;;  %v829_v60 = vadd.f32 %v2988_v17, %v828_v57  ;;  %v830_v61 = vpop.f32.mrb[19].mxu0 }
 0x161   :  { %v2553_v1 = vpack.c.bf16 %v829_v60, %v826_v55  ;;  %v3045_v2 = vsub.f32 %v829_v60, %v2988_v17  ;;  %1835 = vrot.lane.b32.xlu0 %v3040_v59, %s2879_s0  ;;  %v947_v55 = vpop.f32.mrb[13].mxu1 }
 0x162   :  { %v948_v57 = vpop.f32.mrb[14].mxu1 }
 0x163   :  { %2693 = vst [vmem:[#allocation7 + $0x20] sm:$0xff] %v2553_v1   ;;  %1837 = vrot.lane.b32.xlu1 %v3045_v2, %s2879_s0  ;;  %v950_v61 = vpop.f32.mrb[15].mxu1  ;;  %v949_v62 = vadd.f32 %v2988_v17, %v948_v57 }
 0x164   :  { %v833_v5 = vpop.f32.mrb[20].mxu0  ;;  %v953_v1 = vpop.f32.mrb[16].mxu1 }
 0x165   :  { %v834_v7 = vadd.f32 %v2988_v17, %v833_v5  ;;  %v835_v8 = vpop.f32.mrb[21].mxu0  ;;  %v2628_v63 = vpack.c.bf16 %v949_v62, %v946_v56  ;;  %v955_v3 = vpop.f32.mrb[17].mxu1  ;;  %v954_v4 = vadd.f32 %v2988_v17, %v953_v1 }
 0x166   :  { %v836_v9 = vpop.f32.mrb[22].mxu0  ;;  %v956_v5 = vpop.f32.mrb[18].mxu1 }
 0x167   :  { %v3054_v11 = vsub.f32 %v834_v7, %v2988_v17  ;;  %v837_v12 = vadd.f32 %v2988_v17, %v836_v9  ;;  %v838_v13 = vpop.f32.mrb[23].mxu0  ;;  %2708 = vst [vmem:[#allocation7 + $0x98] sm:$0xff] %v2628_v63   ;;  %v958_v6 = vpop.f32.mrb[19].mxu1 }
 0x168   :  { %v961_v9 = vpop.f32.mrb[20].mxu1 }
 0x169   :  { %v2558_v18 = vpack.c.bf16 %v837_v12, %v834_v7  ;;  %v3059_v19 = vsub.f32 %v837_v12, %v2988_v17  ;;  %1839 = vrot.lane.b32.xlu0 %v3054_v11, %s2879_s0  ;;  %v957_v7 = vadd.f32 %v2988_v17, %v956_v5  ;;  %v963_v10 = vpop.f32.mrb[21].mxu1  ;;  %v962_v12 = vadd.f32 %v2988_v17, %v961_v9 }
 0x16a   :  { %v964_v13 = vpop.f32.mrb[22].mxu1 }
 0x16b   :  { %2694 = vst [vmem:[#allocation7 + $0x28] sm:$0xff] %v2558_v18   ;;  %1841 = vrot.lane.b32.xlu1 %v3059_v19, %s2879_s0  ;;  %v2633_v8 = vpack.c.bf16 %v957_v7, %v954_v4  ;;  %v966_v14 = vpop.f32.mrb[23].mxu1  ;;  %v965_v15 = vadd.f32 %v2988_v17, %v964_v13 }
 0x16c   :  { %v841_v23 = vpop.f32.mrb[24].mxu0  ;;  %v969_v18 = vpop.f32.mrb[24].mxu1 }
 0x16d   :  { %v842_v25 = vadd.f32 %v2988_v17, %v841_v23  ;;  %v843_v27 = vpop.f32.mrb[25].mxu0  ;;  %2709 = vst [vmem:[#allocation7 + $0xa0] sm:$0xff] %v2633_v8   ;;  %v2638_v16 = vpack.c.bf16 %v965_v15, %v962_v12  ;;  %v971_v20 = vpop.f32.mrb[25].mxu1  ;;  %v970_v21 = vadd.f32 %v2988_v17, %v969_v18 }
 0x16e   :  { %v844_v28 = vpop.f32.mrb[26].mxu0  ;;  %v972_v23 = vpop.f32.mrb[26].mxu1 }
 0x16f   :  { %v3068_v30 = vsub.f32 %v842_v25, %v2988_v17  ;;  %v845_v32 = vadd.f32 %v2988_v17, %v844_v28  ;;  %v846_v33 = vpop.f32.mrb[27].mxu0  ;;  %2710 = vst [vmem:[#allocation7 + $0xa8] sm:$0xff] %v2638_v16   ;;  %v974_v24 = vpop.f32.mrb[27].mxu1 }
 0x171   :  { %v2563_v38 = vpack.c.bf16 %v845_v32, %v842_v25  ;;  %v3073_v39 = vsub.f32 %v845_v32, %v2988_v17  ;;  %1843 = vrot.lane.b32.xlu0 %v3068_v30, %s2879_s0  ;;  %v973_v25 = vadd.f32 %v2988_v17, %v972_v23 }
 0x173   :  { %2695 = vst [vmem:[#allocation7 + $0x30] sm:$0xff] %v2563_v38   ;;  %1845 = vrot.lane.b32.xlu1 %v3073_v39, %s2879_s0  ;;  %v2643_v27 = vpack.c.bf16 %v973_v25, %v970_v21 }
 0x174   :  { %v849_v43 = vpop.f32.mrb[28].mxu0  ;;  %v977_v28 = vpop.f32.mrb[28].mxu1 }
 0x175   :  { %v850_v46 = vadd.f32 %v2988_v17, %v849_v43  ;;  %v851_v47 = vpop.f32.mrb[29].mxu0  ;;  %2711 = vst [vmem:[#allocation7 + $0xb0] sm:$0xff] %v2643_v27   ;;  %v979_v29 = vpop.f32.mrb[29].mxu1  ;;  %v978_v32 = vadd.f32 %v2988_v17, %v977_v28 }
 0x176   :  { %v852_v48 = vpop.f32.mrb[30].mxu0  ;;  %v980_v33 = vpop.f32.mrb[30].mxu1 }
 0x177   :  { %v3082_v51 = vsub.f32 %v850_v46, %v2988_v17  ;;  %v853_v52 = vadd.f32 %v2988_v17, %v852_v48  ;;  %v854_v54 = vpop.f32.mrb[31].mxu0  ;;  %v982_v34 = vpop.f32.mrb[31].mxu1  ;;  %v981_v36 = vadd.f32 %v2988_v17, %v980_v33 }
 0x179   :  { %v2568_v58 = vpack.c.bf16 %v853_v52, %v850_v46  ;;  %v3087_v60 = vsub.f32 %v853_v52, %v2988_v17  ;;  %1847 = vrot.lane.b32.xlu0 %v3082_v51, %s2879_s0  ;;  %v2648_v37 = vpack.c.bf16 %v981_v36, %v978_v32 }
 0x17b   :  { %2696 = vst [vmem:[#allocation7 + $0x38] sm:$0xff] %v2568_v58   ;;  %1849 = vrot.lane.b32.xlu1 %v3087_v60, %s2879_s0  ;;  %2712 = vst [vmem:[#allocation7 + $0xb8] sm:$0xff] %v2648_v37  }
 0x17c   :  { %v857_v38 = vpop.f32.mrb[32].mxu0  ;;  %v985_v43 = vpop.f32.mrb[32].mxu1 }
 0x17d   :  { %1851 = vrot.lane.b32.xlu0 %v2882_v0, %s2879_s0  ;;  %v859_v41 = vpop.f32.mrb[33].mxu0  ;;  %v858_v42 = vadd.f32 %v2988_v17, %v857_v38  ;;  %v986_v46 = vadd.f32 %v2988_v17, %v985_v43  ;;  %v987_v47 = vpop.f32.mrb[33].mxu1 }
 0x17e   :  { %v860_v45 = vpop.f32.mrb[34].mxu0  ;;  %v988_v52 = vpop.f32.mrb[34].mxu1 }
 0x17f   :  { %1853 = vrot.lane.b32.xlu1 %v2882_v0, %s2879_s0  ;;  %v862_v48 = vpop.f32.mrb[35].mxu0  ;;  %v861_v50 = vadd.f32 %v2988_v17, %v860_v45  ;;  %v989_v54 = vadd.f32 %v2988_v17, %v988_v52  ;;  %v990_v55 = vpop.f32.mrb[35].mxu1 }
 0x181   :  { %1855 = vrot.lane.b32.xlu0 %v2882_v0, %s2879_s0  ;;  %v2573_v56 = vpack.c.bf16 %v861_v50, %v858_v42  ;;  %v2653_v57 = vpack.c.bf16 %v989_v54, %v986_v46 }
 0x183   :  { %1857 = vrot.lane.b32.xlu1 %v2882_v0, %s2879_s0  ;;  %2697 = vst [vmem:[#allocation7 + $0x40] sm:$0xff] %v2573_v56   ;;  %2713 = vst [vmem:[#allocation7 + $0xc0] sm:$0xff] %v2653_v57  }
 0x184   :  { %v865_v58 = vpop.f32.mrb[36].mxu0  ;;  %v993_v63 = vpop.f32.mrb[36].mxu1 }
 0x185   :  { %1859 = vrot.lane.b32.xlu0 %v2882_v0, %s2879_s0  ;;  %v867_v61 = vpop.f32.mrb[37].mxu0  ;;  %v866_v62 = vadd.f32 %v2988_v17, %v865_v58  ;;  %v994_v3 = vadd.f32 %v2988_v17, %v993_v63  ;;  %v995_v4 = vpop.f32.mrb[37].mxu1 }
 0x186   :  { %v868_v1 = vpop.f32.mrb[38].mxu0  ;;  %v996_v7 = vpop.f32.mrb[38].mxu1 }
 0x187   :  { %1861 = vrot.lane.b32.xlu1 %v2882_v0, %s2879_s0  ;;  %v870_v5 = vpop.f32.mrb[39].mxu0  ;;  %v869_v6 = vadd.f32 %v2988_v17, %v868_v1  ;;  %v997_v8 = vadd.f32 %v2988_v17, %v996_v7  ;;  %v998_v9 = vpop.f32.mrb[39].mxu1 }
 0x189   :  { %1863 = vrot.lane.b32.xlu0 %v2882_v0, %s2879_s0  ;;  %v2578_v10 = vpack.c.bf16 %v869_v6, %v866_v62  ;;  %v2658_v12 = vpack.c.bf16 %v997_v8, %v994_v3 }
 0x18b   :  { %1865 = vrot.lane.b32.xlu1 %v2882_v0, %s2879_s0  ;;  %2698 = vst [vmem:[#allocation7 + $0x48] sm:$0xff] %v2578_v10   ;;  %2714 = vst [vmem:[#allocation7 + $0xc8] sm:$0xff] %v2658_v12  }
 0x18c   :  { %v873_v13 = vpop.f32.mrb[40].mxu0  ;;  %v1001_v16 = vpop.f32.mrb[40].mxu1 }
 0x18d   :  { %1867 = vrot.lane.b32.xlu0 %v2882_v0, %s2879_s0  ;;  %v875_v14 = vpop.f32.mrb[41].mxu0  ;;  %v874_v15 = vadd.f32 %v2988_v17, %v873_v13  ;;  %v1002_v20 = vadd.f32 %v2988_v17, %v1001_v16  ;;  %v1003_v21 = vpop.f32.mrb[41].mxu1 }
 0x18e   :  { %v876_v18 = vpop.f32.mrb[42].mxu0  ;;  %v1004_v25 = vpop.f32.mrb[42].mxu1 }
 0x18f   :  { %1869 = vrot.lane.b32.xlu1 %v2882_v0, %s2879_s0  ;;  %v878_v23 = vpop.f32.mrb[43].mxu0  ;;  %v877_v24 = vadd.f32 %v2988_v17, %v876_v18  ;;  %v1005_v27 = vadd.f32 %v2988_v17, %v1004_v25  ;;  %v1006_v28 = vpop.f32.mrb[43].mxu1 }
 0x191   :  { %1871 = vrot.lane.b32.xlu0 %v2882_v0, %s2879_s0  ;;  %v2583_v29 = vpack.c.bf16 %v877_v24, %v874_v15  ;;  %v2663_v32 = vpack.c.bf16 %v1005_v27, %v1002_v20 }
 0x193   :  { %1873 = vrot.lane.b32.xlu1 %v2882_v0, %s2879_s0  ;;  %2699 = vst [vmem:[#allocation7 + $0x50] sm:$0xff] %v2583_v29   ;;  %2715 = vst [vmem:[#allocation7 + $0xd0] sm:$0xff] %v2663_v32  }
 0x194   :  { %v881_v33 = vpop.f32.mrb[44].mxu0  ;;  %v1009_v37 = vpop.f32.mrb[44].mxu1 }
 0x195   :  { %1875 = vrot.lane.b32.xlu0 %v2882_v0, %s2879_s0  ;;  %v883_v34 = vpop.f32.mrb[45].mxu0  ;;  %v882_v36 = vadd.f32 %v2988_v17, %v881_v33  ;;  %v1010_v41 = vadd.f32 %v2988_v17, %v1009_v37  ;;  %v1011_v42 = vpop.f32.mrb[45].mxu1 }
 0x196   :  { %v884_v38 = vpop.f32.mrb[46].mxu0  ;;  %v1012_v46 = vpop.f32.mrb[46].mxu1 }
 0x197   :  { %1877 = vrot.lane.b32.xlu1 %v2882_v0, %s2879_s0  ;;  %v886_v43 = vpop.f32.mrb[47].mxu0  ;;  %v885_v45 = vadd.f32 %v2988_v17, %v884_v38  ;;  %v1013_v47 = vadd.f32 %v2988_v17, %v1012_v46  ;;  %v1014_v48 = vpop.f32.mrb[47].mxu1 }
 0x199   :  { %1879 = vrot.lane.b32.xlu0 %v2882_v0, %s2879_s0  ;;  %v2588_v50 = vpack.c.bf16 %v885_v45, %v882_v36  ;;  %v2668_v54 = vpack.c.bf16 %v1013_v47, %v1010_v41 }
 0x19b   :  { %1881 = vrot.lane.b32.xlu1 %v2882_v0, %s2879_s0  ;;  %2700 = vst [vmem:[#allocation7 + $0x58] sm:$0xff] %v2588_v50   ;;  %2716 = vst [vmem:[#allocation7 + $0xd8] sm:$0xff] %v2668_v54  }
 0x19c   :  { %v889_v55 = vpop.f32.mrb[48].mxu0  ;;  %v1017_v61 = vpop.f32.mrb[48].mxu1 }
 0x19d   :  { %1883 = vrot.lane.b32.xlu0 %v2882_v0, %s2879_s0  ;;  %v891_v57 = vpop.f32.mrb[49].mxu0  ;;  %v890_v58 = vadd.f32 %v2988_v17, %v889_v55  ;;  %v1018_v63 = vadd.f32 %v2988_v17, %v1017_v61  ;;  %v1019_v1 = vpop.f32.mrb[49].mxu1 }
 0x19e   :  { %v892_v62 = vpop.f32.mrb[50].mxu0  ;;  %v1020_v5 = vpop.f32.mrb[50].mxu1 }
 0x19f   :  { %1885 = vrot.lane.b32.xlu1 %v2882_v0, %s2879_s0  ;;  %v894_v3 = vpop.f32.mrb[51].mxu0  ;;  %v893_v4 = vadd.f32 %v2988_v17, %v892_v62  ;;  %v1021_v7 = vadd.f32 %v2988_v17, %v1020_v5  ;;  %v1022_v8 = vpop.f32.mrb[51].mxu1 }
 0x1a1   :  { %1887 = vrot.lane.b32.xlu0 %v2882_v0, %s2879_s0  ;;  %v2593_v9 = vpack.c.bf16 %v893_v4, %v890_v58  ;;  %v2673_v10 = vpack.c.bf16 %v1021_v7, %v1018_v63 }
 0x1a3   :  { %1889 = vrot.lane.b32.xlu1 %v2882_v0, %s2879_s0  ;;  %2701 = vst [vmem:[#allocation7 + $0x60] sm:$0xff] %v2593_v9   ;;  %2717 = vst [vmem:[#allocation7 + $0xe0] sm:$0xff] %v2673_v10  }
 0x1a4   :  { %v897_v14 = vpop.f32.mrb[52].mxu0  ;;  %v1025_v23 = vpop.f32.mrb[52].mxu1 }
 0x1a5   :  { %1891 = vrot.lane.b32.xlu0 %v2882_v0, %s2879_s0  ;;  %v899_v16 = vpop.f32.mrb[53].mxu0  ;;  %v898_v21 = vadd.f32 %v2988_v17, %v897_v14  ;;  %v1026_v25 = vadd.f32 %v2988_v17, %v1025_v23  ;;  %v1027_v27 = vpop.f32.mrb[53].mxu1 }
 0x1a6   :  { %v900_v24 = vpop.f32.mrb[54].mxu0  ;;  %v1028_v34 = vpop.f32.mrb[54].mxu1 }
 0x1a7   :  { %1893 = vrot.lane.b32.xlu1 %v2882_v0, %s2879_s0  ;;  %v902_v28 = vpop.f32.mrb[55].mxu0  ;;  %v901_v33 = vadd.f32 %v2988_v17, %v900_v24  ;;  %v1029_v36 = vadd.f32 %v2988_v17, %v1028_v34  ;;  %v1030_v37 = vpop.f32.mrb[55].mxu1 }
 0x1a9   :  { %1895 = vrot.lane.b32.xlu0 %v2882_v0, %s2879_s0  ;;  %v2598_v42 = vpack.c.bf16 %v901_v33, %v898_v21  ;;  %v2678_v45 = vpack.c.bf16 %v1029_v36, %v1026_v25 }
 0x1ab   :  { %1897 = vrot.lane.b32.xlu1 %v2882_v0, %s2879_s0  ;;  %2702 = vst [vmem:[#allocation7 + $0x68] sm:$0xff] %v2598_v42   ;;  %2718 = vst [vmem:[#allocation7 + $0xe8] sm:$0xff] %v2678_v45  }
 0x1ac   :  { %v905_v47 = vpop.f32.mrb[56].mxu0  ;;  %v1033_v55 = vpop.f32.mrb[56].mxu1 }
 0x1ad   :  { %1899 = vrot.lane.b32.xlu0 %v2882_v0, %s2879_s0  ;;  %v907_v50 = vpop.f32.mrb[57].mxu0  ;;  %v1035_v57 = vpop.f32.mrb[57].mxu1  ;;  %v906_v62 = vadd.f32 %v2988_v17, %v905_v47  ;;  %v1034_v63 = vadd.f32 %v2988_v17, %v1033_v55 }
 0x1ae   :  { %v1036_v3 = vpop.f32.mrb[58].mxu1 }
 0x1af   :  { %1901 = vrot.lane.b32.xlu1 %v2882_v0, %s2879_s0  ;;  %v1037_v5 = vadd.f32 %v2988_v17, %v1036_v3 }
 0x1b1   :  { %1903 = vrot.lane.b32.xlu0 %v2882_v0, %s2879_s0  ;;  %v2683_v10 = vpack.c.bf16 %v1037_v5, %v1034_v63 }
 0x1b3   :  { %1905 = vrot.lane.b32.xlu1 %v2882_v0, %s2879_s0  ;;  %v1820_v52 = vpop.permute.xlu0 %1819  ;;  %2719 = vst [vmem:[#allocation7 + $0xf0] sm:$0xff] %v2683_v10  }
 0x1b4   :  { %v2149_v18 = vmul.f32 %v1820_v52, %v2992_v22 }
 0x1b5   :  { %1907 = vrot.lane.b32.xlu0 %v2882_v0, %s2879_s0 }
 0x1b7   :  { %1909 = vrot.lane.b32.xlu1 %v2882_v0, %s2879_s0  ;;  %v1822_v6 = vpop.permute.xlu0 %1821 }
 0x1b8   :  { %v2150_v12 = vmul.f32 %v1822_v6, %v2998_v26  ;;  %v1038_v6 = vpop.f32.mrb[59].mxu1 }
 0x1b9   :  { %1911 = vrot.lane.b32.xlu0 %v2882_v0, %s2879_s0 }
 0x1ba   :  { %v2213_v29 = vadd.f32 %v2150_v12, %v2149_v18 }
 0x1bb   :  { %1913 = vrot.lane.b32.xlu1 %v2882_v0, %s2879_s0  ;;  %v1824_v56 = vpop.permute.xlu1 %1823 }
 0x1bc   :  { %v2151_v20 = vmul.f32 %v1824_v56, %v3004_v31  ;;  %v908_v56 = vpop.f32.mrb[58].mxu0 }
 0x1bd   :  { %1915 = vrot.lane.b32.xlu0 %v2882_v0, %s2879_s0  ;;  %v910_v58 = vpop.f32.mrb[59].mxu0  ;;  %v909_v1 = vadd.f32 %v2988_v17, %v908_v56 }
 0x1be   :  { %v2214_v38 = vadd.f32 %v2213_v29, %v2151_v20  ;;  %v913_v14 = vpop.f32.mrb[60].mxu0  ;;  %v1041_v20 = vpop.f32.mrb[60].mxu1 }
 0x1bf   :  { %1917 = vrot.lane.b32.xlu1 %v2882_v0, %s2879_s0  ;;  %v1826_v13 = vpop.permute.xlu1 %1825  ;;  %v2603_v8 = vpack.c.bf16 %v909_v1, %v906_v62  ;;  %v915_v16 = vpop.f32.mrb[61].mxu0  ;;  %v914_v27 = vadd.f32 %v2988_v17, %v913_v14  ;;  %v1042_v28 = vadd.f32 %v2988_v17, %v1041_v20 }
 0x1c0   :  { %v2152_v32 = vmul.f32 %v1826_v13, %v3010_v35  ;;  %v916_v21 = vpop.f32.mrb[62].mxu0  ;;  %v1043_v23 = vpop.f32.mrb[61].mxu1 }
 0x1c1   :  { %1919 = vrot.lane.b32.xlu0 %v2882_v0, %s2879_s0  ;;  %2703 = vst [vmem:[#allocation7 + $0x70] sm:$0xff] %v2603_v8   ;;  %v918_v24 = vpop.f32.mrb[63].mxu0  ;;  %v917_v29 = vadd.f32 %v2988_v17, %v916_v21 }
 0x1c2   :  { %v2215_v46 = vadd.f32 %v2214_v38, %v2152_v32  ;;  %v1044_v32 = vpop.f32.mrb[62].mxu1 }
 0x1c3   :  { %1921 = vrot.lane.b32.xlu1 %v2882_v0, %s2879_s0  ;;  %v1828_v15 = vpop.permute.xlu0 %1827  ;;  %v1045_v34 = vadd.f32 %v2988_v17, %v1044_v32  ;;  %v1046_v36 = vpop.f32.mrb[63].mxu1 }
 0x1c4   :  { %v2153_v41 = vmul.f32 %v1828_v15, %v3016_v40 }
 0x1c5   :  { %1923 = vrot.lane.b32.xlu0 %v2882_v0, %s2879_s0  ;;  %v1830_v43 = vpop.permute.xlu1 %1829  ;;  %v2688_v42 = vpack.c.bf16 %v1045_v34, %v1042_v28 }
 0x1c6   :  { %v2216_v52 = vadd.f32 %v2215_v46, %v2153_v41  ;;  %v2154_v54 = vmul.f32 %v1830_v43, %v3020_v44  ;;  %v2608_v41 = vpack.c.bf16 %v917_v29, %v914_v27 }
 0x1c7   :  { %1925 = vrot.lane.b32.xlu1 %v2882_v0, %s2879_s0  ;;  %2720 = vst [vmem:[#allocation7 + $0xf8] sm:$0xff] %v2688_v42  }
 0x1c8   :  { %v2217_v7 = vadd.f32 %v2216_v52, %v2154_v54  ;;  %2704 = vst [vmem:[#allocation7 + $0x78] sm:$0xff] %v2608_v41  }
 0x1c9   :  { %1927 = vrot.lane.b32.xlu0 %v2882_v0, %s2879_s0 }
 0x1cb   :  { %1929 = vrot.lane.b32.xlu1 %v2882_v0, %s2879_s0  ;;  %v1832_v48 = vpop.permute.xlu0 %1831 }
 0x1cc   :  { %v2155_v61 = vmul.f32 %v1832_v48, %v3028_v49 }
 0x1cd   :  { %1931 = vrot.lane.b32.xlu0 %v2882_v0, %s2879_s0  ;;  %v1834_v4 = vpop.permute.xlu1 %1833 }
 0x1ce   :  { %v2218_v12 = vadd.f32 %v2217_v7, %v2155_v61  ;;  %v2156_v13 = vmul.f32 %v1834_v4, %v3032_v53 }
 0x1cf   :  { %1933 = vrot.lane.b32.xlu1 %v2882_v0, %s2879_s0 }
 0x1d0   :  { %v2219_v25 = vadd.f32 %v2218_v12, %v2156_v13 }
 0x1d1   :  { %1935 = vrot.lane.b32.xlu0 %v2882_v0, %s2879_s0 }
 0x1d3   :  { %1937 = vrot.lane.b32.xlu1 %v2882_v0, %s2879_s0  ;;  %v1836_v9 = vpop.permute.xlu0 %1835 }
 0x1d4   :  { %v2157_v18 = vmul.f32 %v1836_v9, %v3040_v59 }
 0x1d5   :  { %1939 = vrot.lane.b32.xlu0 %v2882_v0, %s2879_s0  ;;  %v1838_v15 = vpop.permute.xlu1 %1837 }
 0x1d6   :  { %v2220_v37 = vadd.f32 %v2219_v25, %v2157_v18  ;;  %v2158_v38 = vmul.f32 %v1838_v15, %v3045_v2 }
 0x1d7   :  { %1941 = vrot.lane.b32.xlu1 %v2882_v0, %s2879_s0 }
 0x1d8   :  { %v2221_v46 = vadd.f32 %v2220_v37, %v2158_v38 }
 0x1d9   :  { %1943 = vrot.lane.b32.xlu0 %v2882_v0, %s2879_s0 }
 0x1db   :  { %1945 = vrot.lane.b32.xlu1 %v2882_v0, %s2879_s0  ;;  %v1840_v33 = vpop.permute.xlu0 %1839 }
 0x1dc   :  { %v2159_v43 = vmul.f32 %v1840_v33, %v3054_v11 }
 0x1dd   :  { %v1842_v45 = vpop.permute.xlu1 %1841 }
 0x1de   :  { %2834 = shalt.err (!%p2831_p6)
}
 0x1df   :  { %s2835_s21 = scalar_lea.hbm %s3324_s3, 4096 }
 0x1e0   :  { %p2836_p7 = scmp.ne.s32.totalorder %s3324_s3, %s2835_s21  ;;  %p2839_p8 = scmp.lt.u32.totalorder %s2835_s21, %s3324_s3 }
 0x1e2   :  { %p2841_p9 = pnand %p2839_p8, %p2836_p7 }
 0x1e4   :  { %2844 = shalt.err (!%p2841_p9)
}
 0x1e5   :  { %2300 = dma.vmem_to_hbm [thread:$0]  %s2295_s17, 4096, %s3324_s3, [#allocation4], %s2879_s0, %s2879_s0, %s2880_s13   ;;  %v2222_v17 = vadd.f32 %v2221_v46, %v2159_v43  ;;  %v2160_v0 = vmul.f32 %v1842_v45, %v3059_v19  ;;  %v1844_v47 = vpop.permute.xlu0 %1843  ;;  %v1846_v50 = vpop.permute.xlu1 %1845  ;;  %vm2282_vm0 = vcmask 1040384   ;;  %vm2284_vm1 = vcmask 1041408  }
 0x1e6   :  { %v2161_v48 = vmul.f32 %v1844_v47, %v3068_v30  ;;  %v2162_v55 = vmul.f32 %v1846_v50, %v3073_v39  ;;  %s2884_s3 = smov [#allocation8]   ;;  %vm2286_vm2 = vcmask 1042432  }
 0x1e7   :  { %v2223_v52 = vadd.f32 %v2222_v17, %v2160_v0  ;;  %s2307_s28 = sshll.u32 %s2884_s3, 4  ;;  %s2308_s28 = int_to_ptr.vmem [resolvable:$true] %s2307_s28 }
 0x1e8   :  { %s2845_s29 = scalar_lea.vmem %s2308_s28, 128  ;;  %p2850_p11 = scmp.lt.s32.totalorder %s2308_s28, %s2308_s28 }
 0x1e9   :  { %v2224_v54 = vadd.f32 %v2223_v52, %v2161_v48  ;;  %p2846_p10 = scmp.ne.s32.totalorder %s2308_s28, %s2845_s29  ;;  %p2851_p12 = scmp.lt.s32.totalorder %s2845_s29, %s2845_s29 }
 0x1eb   :  { %v1848_v56 = vpop.permute.xlu0 %1847  ;;  %v2225_v57 = vadd.f32 %v2224_v54, %v2162_v55  ;;  %p2852_p13 = por %p2851_p12, %p2850_p11 }
 0x1ec   :  { %v2163_v58 = vmul.f32 %v1848_v56, %v3082_v51 }
 0x1ed   :  { %v1850_v61 = vpop.permute.xlu1 %1849  ;;  %p2853_p0 = pnand %p2852_p13, %p2846_p10 }
 0x1ee   :  { %v2226_v62 = vadd.f32 %v2225_v57, %v2163_v58  ;;  %v2164_v63 = vmul.f32 %v1850_v61, %v3087_v60 }
 0x1ef   :  { %v1852_v1 = vpop.permute.xlu0 %1851 }
 0x1f0   :  { %v2227_v3 = vadd.f32 %v2226_v62, %v2164_v63  ;;  %v2165_v4 = vmul.f32 0.0, %v1852_v1 }
 0x1f1   :  { %v1854_v5 = vpop.permute.xlu1 %1853 }
 0x1f2   :  { %v2228_v6 = vadd.f32 %v2227_v3, %v2165_v4  ;;  %v2166_v7 = vmul.f32 0.0, %v1854_v5 }
 0x1f3   :  { %v1856_v8 = vpop.permute.xlu0 %1855 }
 0x1f4   :  { %v2229_v9 = vadd.f32 %v2228_v6, %v2166_v7  ;;  %v2167_v10 = vmul.f32 0.0, %v1856_v8  ;;  %v2017_v8 = vmul.f32 %v2998_v26, %v2998_v26 }
 0x1f5   :  { %v1858_v12 = vpop.permute.xlu1 %1857 }
 0x1f6   :  { %v2230_v13 = vadd.f32 %v2229_v9, %v2167_v10  ;;  %v2168_v14 = vmul.f32 0.0, %v1858_v12 }
 0x1f7   :  { %v1860_v15 = vpop.permute.xlu0 %1859 }
 0x1f8   :  { %v2231_v16 = vadd.f32 %v2230_v13, %v2168_v14  ;;  %v2169_v18 = vmul.f32 0.0, %v1860_v15  ;;  %v2016_v13 = vmul.f32 %v2992_v22, %v2992_v22  ;;  %v2018_v14 = vmul.f32 %v3004_v31, %v3004_v31 }
 0x1f9   :  { %v1862_v20 = vpop.permute.xlu1 %1861 }
 0x1fa   :  { %v2232_v21 = vadd.f32 %v2231_v16, %v2169_v18  ;;  %v2170_v23 = vmul.f32 0.0, %v1862_v20  ;;  %v2080_v20 = vadd.f32 %v2017_v8, %v2016_v13 }
 0x1fb   :  { %v1864_v24 = vpop.permute.xlu0 %1863 }
 0x1fc   :  { %v2233_v25 = vadd.f32 %v2232_v21, %v2170_v23  ;;  %v2171_v27 = vmul.f32 0.0, %v1864_v24 }
 0x1fd   :  { %v1866_v28 = vpop.permute.xlu1 %1865 }
 0x1fe   :  { %v2234_v29 = vadd.f32 %v2233_v25, %v2171_v27  ;;  %v2172_v32 = vmul.f32 0.0, %v1866_v28  ;;  %v1947_v25 = vadd.f32 %v2998_v26, %v2992_v22  ;;  %v2081_v27 = vadd.f32 %v2080_v20, %v2018_v14 }
 0x1ff   :  { %v1868_v33 = vpop.permute.xlu0 %1867  ;;  %v2019_v28 = vmul.f32 %v3010_v35, %v3010_v35 }
 0x200   :  { %v2235_v34 = vadd.f32 %v2234_v29, %v2172_v32  ;;  %v2173_v36 = vmul.f32 0.0, %v1868_v33 }
 0x201   :  { %v1870_v37 = vpop.permute.xlu1 %1869 }
 0x202   :  { %v2236_v38 = vadd.f32 %v2235_v34, %v2173_v36  ;;  %v2174_v41 = vmul.f32 0.0, %v1870_v37  ;;  %v1948_v34 = vadd.f32 %v1947_v25, %v3004_v31  ;;  %v2020_v36 = vmul.f32 %v3016_v40, %v3016_v40 }
 0x203   :  { %v1872_v42 = vpop.permute.xlu0 %1871 }
 0x204   :  { %v2237_v43 = vadd.f32 %v2236_v38, %v2174_v41  ;;  %v2175_v45 = vmul.f32 0.0, %v1872_v42  ;;  %v2082_v42 = vadd.f32 %v2081_v27, %v2019_v28  ;;  %v1949_v22 = vadd.f32 %v1948_v34, %v3010_v35 }
 0x205   :  { %v1874_v46 = vpop.permute.xlu1 %1873  ;;  %v2027_v34 = vmul.f32 %v3059_v19, %v3059_v19 }
 0x206   :  { %v2238_v17 = vadd.f32 %v2237_v43, %v2175_v45  ;;  %v2176_v0 = vmul.f32 0.0, %v1874_v46  ;;  %v2083_v26 = vadd.f32 %v2082_v42, %v2020_v36  ;;  %v1950_v31 = vadd.f32 %v1949_v22, %v3016_v40 }
 0x207   :  { %v1876_v47 = vpop.permute.xlu0 %1875 }
 0x208   :  { %v2239_v48 = vadd.f32 %v2238_v17, %v2176_v0  ;;  %v2177_v50 = vmul.f32 0.0, %v1876_v47  ;;  %v2021_v17 = vmul.f32 %v3020_v44, %v3020_v44  ;;  %v1951_v35 = vadd.f32 %v1950_v31, %v3020_v44 }
 0x209   :  { %v1878_v52 = vpop.permute.xlu1 %1877 }
 0x20a   :  { %v2240_v54 = vadd.f32 %v2239_v48, %v2177_v50  ;;  %v2178_v55 = vmul.f32 0.0, %v1878_v52  ;;  %v2022_v50 = vmul.f32 %v3028_v49, %v3028_v49  ;;  %v1952_v40 = vadd.f32 %v1951_v35, %v3028_v49 }
 0x20b   :  { %v1880_v56 = vpop.permute.xlu0 %1879 }
 0x20c   :  { %v2241_v57 = vadd.f32 %v2240_v54, %v2178_v55  ;;  %v2179_v58 = vmul.f32 0.0, %v1880_v56  ;;  %v2084_v56 = vadd.f32 %v2083_v26, %v2021_v17  ;;  %v1953_v44 = vadd.f32 %v1952_v40, %v3032_v53 }
 0x20d   :  { %v1882_v61 = vpop.permute.xlu1 %1881 }
 0x20e   :  { %v2242_v62 = vadd.f32 %v2241_v57, %v2179_v58  ;;  %v2180_v63 = vmul.f32 0.0, %v1882_v61  ;;  %v1954_v49 = vadd.f32 %v1953_v44, %v3040_v59 }
 0x20f   :  { %v1884_v1 = vpop.permute.xlu0 %1883 }
 0x210   :  { %v2243_v3 = vadd.f32 %v2242_v62, %v2180_v63  ;;  %v2181_v4 = vmul.f32 0.0, %v1884_v1  ;;  %v2085_v62 = vadd.f32 %v2084_v56, %v2022_v50  ;;  %v2023_v63 = vmul.f32 %v3032_v53, %v3032_v53 }
 0x211   :  { %v1886_v5 = vpop.permute.xlu1 %1885  ;;  %v1955_v53 = vadd.f32 %v1954_v49, %v3045_v2 }
 0x212   :  { %v2244_v6 = vadd.f32 %v2243_v3, %v2181_v4  ;;  %v2182_v7 = vmul.f32 0.0, %v1886_v5  ;;  %v2024_v5 = vmul.f32 %v3040_v59, %v3040_v59 }
 0x213   :  { %v1888_v9 = vpop.permute.xlu0 %1887  ;;  %v1956_v59 = vadd.f32 %v1955_v53, %v3054_v11 }
 0x214   :  { %v2245_v10 = vadd.f32 %v2244_v6, %v2182_v7  ;;  %v2183_v12 = vmul.f32 0.0, %v1888_v9  ;;  %v2086_v9 = vadd.f32 %v2085_v62, %v2023_v63  ;;  %v2031_v63 = vmul.f32 %v3087_v60, %v3087_v60 }
 0x215   :  { %v1890_v15 = vpop.permute.xlu1 %1889 }
 0x216   :  { %v2246_v16 = vadd.f32 %v2245_v10, %v2183_v12  ;;  %v2184_v18 = vmul.f32 0.0, %v1890_v15  ;;  %v2087_v14 = vadd.f32 %v2086_v9, %v2024_v5  ;;  %v2025_v15 = vmul.f32 %v3045_v2, %v3045_v2 }
 0x217   :  { %v1892_v21 = vpop.permute.xlu0 %1891  ;;  %v1957_v2 = vadd.f32 %v1956_v59, %v3059_v19 }
 0x218   :  { %v2247_v23 = vadd.f32 %v2246_v16, %v2184_v18  ;;  %v2185_v24 = vmul.f32 0.0, %v1892_v21  ;;  %v2026_v21 = vmul.f32 %v3054_v11, %v3054_v11  ;;  %v2088_v27 = vadd.f32 %v2087_v14, %v2025_v15 }
 0x219   :  { %v1894_v29 = vpop.permute.xlu1 %1893  ;;  %v1958_v11 = vadd.f32 %v1957_v2, %v3068_v30 }
 0x21a   :  { %v2248_v32 = vadd.f32 %v2247_v23, %v2185_v24  ;;  %v2186_v33 = vmul.f32 0.0, %v1894_v29 }
 0x21b   :  { %v1896_v37 = vpop.permute.xlu0 %1895  ;;  %v1959_v19 = vadd.f32 %v1958_v11, %v3073_v39 }
 0x21c   :  { %v2249_v38 = vadd.f32 %v2248_v32, %v2186_v33  ;;  %v2187_v41 = vmul.f32 0.0, %v1896_v37  ;;  %v2089_v33 = vadd.f32 %v2088_v27, %v2026_v21 }
 0x21d   :  { %v1898_v43 = vpop.permute.xlu1 %1897 }
 0x21e   :  { %v2250_v45 = vadd.f32 %v2249_v38, %v2187_v41  ;;  %v2188_v46 = vmul.f32 0.0, %v1898_v43  ;;  %v2028_v41 = vmul.f32 %v3068_v30, %v3068_v30  ;;  %v1960_v30 = vadd.f32 %v1959_v19, %v3082_v51 }
 0x21f   :  { %v1900_v0 = vpop.permute.xlu0 %1899 }
 0x220   :  { %v2251_v47 = vadd.f32 %v2250_v45, %v2188_v46  ;;  %v2189_v48 = vmul.f32 0.0, %v1900_v0  ;;  %v2090_v46 = vadd.f32 %v2089_v33, %v2027_v34 }
 0x221   :  { %v1902_v52 = vpop.permute.xlu1 %1901 }
 0x222   :  { %v2252_v54 = vadd.f32 %v2251_v47, %v2189_v48  ;;  %v2190_v55 = vmul.f32 0.0, %v1902_v52  ;;  %v2091_v0 = vadd.f32 %v2090_v46, %v2028_v41  ;;  %v2029_v47 = vmul.f32 %v3073_v39, %v3073_v39 }
 0x223   :  { %v1904_v57 = vpop.permute.xlu0 %1903  ;;  %v2030_v52 = vmul.f32 %v3082_v51, %v3082_v51 }
 0x224   :  { %v2253_v58 = vadd.f32 %v2252_v54, %v2190_v55  ;;  %v2191_v61 = vmul.f32 0.0, %v1904_v57  ;;  %v2092_v57 = vadd.f32 %v2091_v0, %v2029_v47 }
 0x225   :  { %v1906_v1 = vpop.permute.xlu1 %1905 }
 0x226   :  { %v2254_v3 = vadd.f32 %v2253_v58, %v2191_v61  ;;  %v2192_v4 = vmul.f32 0.0, %v1906_v1  ;;  %v2093_v62 = vadd.f32 %v2092_v57, %v2030_v52 }
 0x227   :  { %v1908_v6 = vpop.permute.xlu0 %1907 }
 0x228   :  { %v2255_v7 = vadd.f32 %v2254_v3, %v2192_v4  ;;  %v2193_v8 = vmul.f32 0.0, %v1908_v6 }
 0x229   :  { %v1910_v10 = vpop.permute.xlu1 %1909 }
 0x22a   :  { %v2256_v12 = vadd.f32 %v2255_v7, %v2193_v8  ;;  %v2194_v13 = vmul.f32 0.0, %v1910_v10  ;;  %v2094_v7 = vadd.f32 %v2093_v62, %v2031_v63 }
 0x22b   :  { %v1912_v16 = vpop.permute.xlu0 %1911 }
 0x22c   :  { %v2257_v18 = vadd.f32 %v2256_v12, %v2194_v13  ;;  %v2195_v20 = vmul.f32 0.0, %v1912_v16  ;;  %v1961_v12 = vadd.f32 %v1960_v30, %v3087_v60  ;;  %v2143_v14 = vrot.slane %v2094_v7, 4 }
 0x22d   :  { %v1914_v23 = vpop.permute.xlu1 %1913 }
 0x22e   :  { %v2258_v24 = vadd.f32 %v2257_v18, %v2195_v20  ;;  %v2196_v25 = vmul.f32 0.0, %v1914_v23  ;;  %v2010_v20 = vrot.slane %v1961_v12, 4 }
 0x22f   :  { %v1916_v28 = vpop.permute.xlu0 %1915 }
 0x230   :  { %v2259_v29 = vadd.f32 %v2258_v24, %v2196_v25  ;;  %v2197_v32 = vmul.f32 0.0, %v1916_v28  ;;  %v2144_v24 = vadd.f32 %v2143_v14, %v2094_v7  ;;  %v2011_v28 = vadd.f32 %v2010_v20, %v1961_v12 }
 0x231   :  { %v1918_v36 = vpop.permute.xlu1 %1917 }
 0x232   :  { %v2260_v37 = vadd.f32 %v2259_v29, %v2197_v32  ;;  %v2198_v38 = vmul.f32 0.0, %v1918_v36  ;;  %v2145_v33 = vrot.slane %v2144_v24, 2 }
 0x233   :  { %v1920_v42 = vpop.permute.xlu0 %1919 }
 0x234   :  { %v2261_v43 = vadd.f32 %v2260_v37, %v2198_v38  ;;  %v2199_v45 = vmul.f32 0.0, %v1920_v42  ;;  %v2012_v37 = vrot.slane %v2011_v28, 2  ;;  %v2146_v59 = vadd.f32 %v2145_v33, %v2144_v24 }
 0x235   :  { %v1922_v22 = vpop.permute.xlu1 %1921 }
 0x236   :  { %v2262_v26 = vadd.f32 %v2261_v43, %v2199_v45  ;;  %v2200_v17 = vmul.f32 0.0, %v1922_v22  ;;  %v2013_v42 = vadd.f32 %v2012_v37, %v2011_v28  ;;  %v2147_v45 = vrot.slane %v2146_v59, 1 }
 0x237   :  { %v1924_v48 = vpop.permute.xlu0 %1923 }
 0x238   :  { %v2263_v31 = vadd.f32 %v2262_v26, %v2200_v17  ;;  %v2201_v50 = vmul.f32 0.0, %v1924_v48  ;;  %v2014_v22 = vrot.slane %v2013_v42, 1  ;;  %v2148_v17 = vadd.f32 %v2147_v45, %v2146_v59 }
 0x239   :  { %v1926_v54 = vpop.permute.xlu1 %1925 }
 0x23a   :  { %v2264_v55 = vadd.f32 %v2263_v31, %v2201_v50  ;;  %v2202_v56 = vmul.f32 0.0, %v1926_v54  ;;  %v2015_v0 = vadd.f32 %v2014_v22, %v2013_v42 }
 0x23b   :  { %v1928_v58 = vpop.permute.xlu0 %1927 }
 0x23c   :  { %v2265_v61 = vadd.f32 %v2264_v55, %v2202_v56  ;;  %v2203_v35 = vmul.f32 0.0, %v1928_v58  ;;  %v2283_v48 = vsel %vm2282_vm0, %v2015_v0, %v2148_v17 }
 0x23d   :  { %v1930_v1 = vpop.permute.xlu1 %1929 }
 0x23e   :  { %v2266_v3 = vadd.f32 %v2265_v61, %v2203_v35  ;;  %v2204_v4 = vmul.f32 0.0, %v1930_v1 }
 0x23f   :  { %v1932_v40 = vpop.permute.xlu0 %1931 }
 0x240   :  { %v2267_v5 = vadd.f32 %v2266_v3, %v2204_v4  ;;  %v2205_v6 = vmul.f32 0.0, %v1932_v40 }
 0x241   :  { %v1934_v8 = vpop.permute.xlu1 %1933 }
 0x242   :  { %v2268_v9 = vadd.f32 %v2267_v5, %v2205_v6  ;;  %v2206_v10 = vmul.f32 0.0, %v1934_v8 }
 0x243   :  { %v1936_v13 = vpop.permute.xlu0 %1935 }
 0x244   :  { %v2269_v39 = vadd.f32 %v2268_v9, %v2206_v10  ;;  %v2207_v44 = vmul.f32 0.0, %v1936_v13 }
 0x245   :  { %v1938_v15 = vpop.permute.xlu1 %1937 }
 0x246   :  { %v2270_v16 = vadd.f32 %v2269_v39, %v2207_v44  ;;  %v2208_v18 = vmul.f32 0.0, %v1938_v15 }
 0x247   :  { %v1940_v49 = vpop.permute.xlu0 %1939 }
 0x248   :  { %v2271_v21 = vadd.f32 %v2270_v16, %v2208_v18  ;;  %v2209_v51 = vmul.f32 0.0, %v1940_v49 }
 0x249   :  { %v1942_v23 = vpop.permute.xlu1 %1941 }
 0x24a   :  { %v2272_v25 = vadd.f32 %v2271_v21, %v2209_v51  ;;  %v2210_v27 = vmul.f32 0.0, %v1942_v23 }
 0x24b   :  { %v1944_v29 = vpop.permute.xlu0 %1943 }
 0x24c   :  { %v2273_v32 = vadd.f32 %v2272_v25, %v2210_v27  ;;  %v2211_v53 = vmul.f32 0.0, %v1944_v29 }
 0x24d   :  { %v1946_v60 = vpop.permute.xlu1 %1945 }
 0x24e   :  { %v2274_v34 = vadd.f32 %v2273_v32, %v2211_v53  ;;  %v2212_v36 = vmul.f32 0.0, %v1946_v60 }
 0x250   :  { %v2275_v38 = vadd.f32 %v2274_v34, %v2212_v36 }
 0x252   :  { %v2276_v41 = vrot.slane %v2275_v38, 4 }
 0x254   :  { %v2277_v43 = vadd.f32 %v2276_v41, %v2275_v38 }
 0x256   :  { %v2278_v46 = vrot.slane %v2277_v43, 2 }
 0x258   :  { %v2279_v26 = vadd.f32 %v2278_v46, %v2277_v43 }
 0x25a   :  { %v2280_v2 = vrot.slane %v2279_v26, 1 }
 0x25c   :  { %v2281_v47 = vadd.f32 %v2280_v2, %v2279_v26 }
 0x25e   :  { %v2285_v31 = vsel %vm2284_vm1, %v2283_v48, %v2281_v47 }
 0x25f   :  { %v2287_v50 = vsel %vm2286_vm2, %v2285_v31, 0.0 }
 0x260   :  { %2288 = vst [vmem:[#allocation8] sm:$0xff] %v2287_v50 }
 0x261   :  { %2856 = shalt.err (!%p2853_p0)
}
 0x262   :  { %s2857_s6 = scalar_lea.hbm %s3325_s4, 128 }
 0x263   :  { %p2858_p1 = scmp.ne.s32.totalorder %s3325_s4, %s2857_s6  ;;  %p2861_p2 = scmp.lt.u32.totalorder %s2857_s6, %s3325_s4 }
 0x265   :  { %p2863_p3 = pnand %p2861_p2, %p2858_p1 }
 0x267   :  { %2866 = shalt.err (!%p2863_p3)
}
 0x268   :  { %2310 = dma.vmem_to_hbm [thread:$0]  %s2308_s28, 128, %s3325_s4, [#allocation9]  }
 0x269   :  { %2871 = dma.done.wait [#allocation4], 4096  }
 0x26a   :  { %2872 = vsyncadd [#allocation4], 4294963200 }
 0x26b   :  { %2873 = dma.done.wait [#allocation9], 128  }
 0x26c   :  { %2874 = vsyncadd [#allocation9], 4294967168 }
 0x26d   :  { %2317 = vsyncpa [#allocation3], 1 }
 0x26e   :  { %2318 = vsyncpa [#allocation6], 1 }
 0x26f   :  { %2319 = vsyncpa [#allocation4], 1 }
 0x270   :  { %2320 = vsyncpa [#allocation9], 1 }

</bundles_post_ra>
